<compile_context>
chip_gen: v5e
topology: v5e:2x2
jax: 0.10.0
libtpu: 0.0.40
codegen_flags: <defaults>
</compile_context>

<pallas_src>
import functools

import jax
import jax.numpy as jnp
from jax.experimental import pallas as pl
from jax.experimental.pallas import tpu as pltpu


LN_EPS = 1e-5  # PyTorch nn.LayerNorm default eps


def _round_up(x, m):
    return ((x + m - 1) // m) * m


def _linear_ln(h_bf16, w_bf16, b, g, be, n_real, relu):
    """LayerNorm(h @ W + b) * gamma + beta, optional ReLU.

    h_bf16 : (TILE_B, K) bf16      w_bf16 : (K, N) bf16  (zero-padded)
    b/g/be : (1, N) f32            n_real : real (unpadded) feature count.
    Padded columns of W/b are zero, so padded columns of y are exactly zero
    and the one-pass statistics (divided by n_real) are exact.  Padded gamma
    and beta are zero, so padded output columns come out as exactly zero.
    """
    y = jnp.dot(h_bf16, w_bf16, preferred_element_type=jnp.float32) + b
    inv_n = jnp.float32(1.0 / n_real)
    s = jnp.sum(y, axis=-1, keepdims=True)
    ss = jnp.sum(y * y, axis=-1, keepdims=True)
    mean = s * inv_n
    var = ss * inv_n - mean * mean
    out = (y - mean) * jax.lax.rsqrt(var + LN_EPS) * g + be
    if relu:
        out = jnp.maximum(out, 0.0)
    return out


def _genre_nn_kernel(
    x_ref,
    w1_ref, b1_ref, g1_ref, be1_ref,
    w2_ref, b2_ref, g2_ref, be2_ref,
    w3_ref, b3_ref, g3_ref, be3_ref,
    out_ref,
    *, n_hidden, n_out,
):
    # Hoist all (1, N) params / weights once per tile (fc2's are reused twice).
    w1, b1, g1, be1 = w1_ref[...], b1_ref[...], g1_ref[...], be1_ref[...]
    w2, b2, g2, be2 = w2_ref[...], b2_ref[...], g2_ref[...], be2_ref[...]
    w3, b3, g3, be3 = w3_ref[...], b3_ref[...], g3_ref[...], be3_ref[...]

    x = x_ref[...]  # already bf16, zero-padded

    # fc1: Linear -> LayerNorm -> ReLU -> Dropout(identity in eval)
    h = _linear_ln(x, w1, b1, g1, be1, n_hidden, relu=True)
    # fc2 applied twice (same weights), as in the PyTorch forward()
    h = _linear_ln(h.astype(jnp.bfloat16), w2, b2, g2, be2, n_hidden, relu=True)
    h = _linear_ln(h.astype(jnp.bfloat16), w2, b2, g2, be2, n_hidden, relu=True)
    # fc3: Linear -> LayerNorm (no ReLU, no Dropout)
    out = _linear_ln(h.astype(jnp.bfloat16), w3, b3, g3, be3, n_out, relu=False)
    out_ref[...] = out.astype(out_ref.dtype)


def genre_nn_forward(x, params, *, tile_b=256):
    """x: (B, input_size) f32. params: dict of unpadded f32 weights (see init_params)."""
    B, n_in = x.shape
    n_hidden = params["w1"].shape[1]
    n_out = params["w3"].shape[1]

    # Lane-dense (multiples of 128) feature dims; sublane-aligned batch tiles.
    in_p = _round_up(n_in, 128)
    hid_p = _round_up(n_hidden, 128)
    out_p = _round_up(n_out, 128)

    b_pad8 = _round_up(max(B, 8), 8)
    tb = min(tile_b, b_pad8)            # tile_b and b_pad8 are multiples of 8
    b_pad = _round_up(b_pad8, tb)

    def pad2(a, r, c, dtype):
        return jnp.zeros((r, c), dtype).at[: a.shape[0], : a.shape[1]].set(
            a.astype(dtype))

    # Streamed input: bf16, zero-padded (padded K columns meet zero W rows).
    xp = pad2(x, b_pad, in_p, jnp.bfloat16)

    # Weights in bf16 (MXU-native, halves resident VMEM); bias/LN params in f32.
    w1 = pad2(params["w1"], in_p, hid_p, jnp.bfloat16)
    w2 = pad2(params["w2"], hid_p, hid_p, jnp.bfloat16)
    w3 = pad2(params["w3"], hid_p, out_p, jnp.bfloat16)
    b1 = pad2(params["b1"], 1, hid_p, jnp.float32)
    b2 = pad2(params["b2"], 1, hid_p, jnp.float32)
    b3 = pad2(params["b3"], 1, out_p, jnp.float32)
    g1 = pad2(params["g1"], 1, hid_p, jnp.float32)   # padded gamma cols -> 0
    g2 = pad2(params["g2"], 1, hid_p, jnp.float32)
    g3 = pad2(params["g3"], 1, out_p, jnp.float32)
    be1 = pad2(params["be1"], 1, hid_p, jnp.float32)
    be2 = pad2(params["be2"], 1, hid_p, jnp.float32)
    be3 = pad2(params["be3"], 1, out_p, jnp.float32)

    args = (xp, w1, b1, g1, be1, w2, b2, g2, be2, w3, b3, g3, be3)

    def resident(a):
        # Same block index every grid step -> DMA'd once, stays VMEM-resident.
        return pl.BlockSpec(a.shape, lambda i: (0, 0))

    kernel = functools.partial(_genre_nn_kernel, n_hidden=n_hidden, n_out=n_out)

    out_padded = pl.pallas_call(
        kernel,
        out_shape=jax.ShapeDtypeStruct((b_pad, out_p), jnp.float32),
        grid=(b_pad // tb,),
        in_specs=[pl.BlockSpec((tb, in_p), lambda i: (i, 0))]
        + [resident(a) for a in args[1:]],
        out_specs=pl.BlockSpec((tb, out_p), lambda i: (i, 0)),
        compiler_params=pltpu.CompilerParams(
            dimension_semantics=("parallel",),   # v7x: shard batch over 2 TCs
        ),
    )(*args)

    return out_padded[:B, :n_out]


def init_params(key, input_size, hidden_size, output_size):
    """Deterministic synthetic parameters matching GenreNN's shapes.

    Linear weights stored as (in, out) — transposed vs. PyTorch's (out, in).
    LayerNorm: gamma=1, beta=0 (PyTorch default init), stored as (1, dim).
    """
    k1, k2, k3, k4, k5, k6 = jax.random.split(key, 6)
    scale1 = 1.0 / jnp.sqrt(input_size)
    scale2 = 1.0 / jnp.sqrt(hidden_size)

    return {
        # fc1: Linear(input_size, hidden_size) + LayerNorm(hidden_size)
        "w1": jax.random.uniform(k1, (input_size, hidden_size), jnp.float32,
                                 -scale1, scale1),
        "b1": jax.random.uniform(k2, (1, hidden_size), jnp.float32,
                                 -scale1, scale1),
        "g1": jnp.ones((1, hidden_size), jnp.float32),
        "be1": jnp.zeros((1, hidden_size), jnp.float32),
        # fc2: Linear(hidden_size, hidden_size) + LayerNorm(hidden_size)
        "w2": jax.random.uniform(k3, (hidden_size, hidden_size), jnp.float32,
                                 -scale2, scale2),
        "b2": jax.random.uniform(k4, (1, hidden_size), jnp.float32,
                                 -scale2, scale2),
        "g2": jnp.ones((1, hidden_size), jnp.float32),
        "be2": jnp.zeros((1, hidden_size), jnp.float32),
        # fc3: Linear(hidden_size, output_size) + LayerNorm(output_size)
        "w3": jax.random.uniform(k5, (hidden_size, output_size), jnp.float32,
                                 -scale2, scale2),
        "b3": jax.random.uniform(k6, (1, output_size), jnp.float32,
                                 -scale2, scale2),
        "g3": jnp.ones((1, output_size), jnp.float32),
        "be3": jnp.zeros((1, output_size), jnp.float32),
    }


def _reference_forward(x, p):
    """Pure-JAX reference (same bf16-matmul / f32-LN recipe as the kernel)."""
    def block(h, w, b, g, be, relu):
        y = jnp.dot(h.astype(jnp.bfloat16), w.astype(jnp.bfloat16),
                    preferred_element_type=jnp.float32) + b
        mean = jnp.mean(y, axis=-1, keepdims=True)
        var = jnp.mean((y - mean) ** 2, axis=-1, keepdims=True)
        y = (y - mean) * jax.lax.rsqrt(var + LN_EPS) * g + be
        return jnp.maximum(y, 0.0) if relu else y

    h = block(x, p["w1"], p["b1"], p["g1"], p["be1"], True)
    h = block(h, p["w2"], p["b2"], p["g2"], p["be2"], True)
    h = block(h, p["w2"], p["b2"], p["g2"], p["be2"], True)
    return block(h, p["w3"], p["b3"], p["g3"], p["be3"], False)


if __name__ == "__main__":
    # Small shapes consistent with the module; odd sizes exercise the padding
    # paths (input 20 -> 128 lanes, output 10 -> 128 lanes, batch 200 -> 256).
    batch = 200
    input_size = 20
    hidden_size = 128
    output_size = 10

    key = jax.random.PRNGKey(0)
    kx, kp = jax.random.split(key)
    x = jax.random.normal(kx, (batch, input_size), jnp.float32)
    params = init_params(kp, input_size, hidden_size, output_size)

    out = genre_nn_forward(x, params, tile_b=64)   # grid of 4 batch tiles
    out = jax.block_until_ready(out)

    ref = _reference_forward(x, params)
    assert out.shape == (batch, output_size)
    assert jnp.allclose(out, ref, atol=2e-3, rtol=2e-3), (
        float(jnp.max(jnp.abs(out - ref))))

    print("KERNEL_OK")
</pallas_src>

<mosaic_0001>
module attributes {stable_mosaic.version = 11 : i64} {
  func.func @_genre_nn_kernel(%arg0: i32, %arg1: memref<64x128xbf16, #tpu.memory_space<vmem>>, %arg2: memref<128x128xbf16, #tpu.memory_space<vmem>>, %arg3: memref<1x128xf32, #tpu.memory_space<vmem>>, %arg4: memref<1x128xf32, #tpu.memory_space<vmem>>, %arg5: memref<1x128xf32, #tpu.memory_space<vmem>>, %arg6: memref<128x128xbf16, #tpu.memory_space<vmem>>, %arg7: memref<1x128xf32, #tpu.memory_space<vmem>>, %arg8: memref<1x128xf32, #tpu.memory_space<vmem>>, %arg9: memref<1x128xf32, #tpu.memory_space<vmem>>, %arg10: memref<128x128xbf16, #tpu.memory_space<vmem>>, %arg11: memref<1x128xf32, #tpu.memory_space<vmem>>, %arg12: memref<1x128xf32, #tpu.memory_space<vmem>>, %arg13: memref<1x128xf32, #tpu.memory_space<vmem>>, %arg14: memref<64x128xf32, #tpu.memory_space<vmem>>) attributes {dimension_semantics = [#tpu.dimension_semantics<parallel>], iteration_bounds = array<i64: 4>, scalar_prefetch = 0 : i64, scratch_operands = 0 : i64, tpu.core_type = #tpu.core_type<tc>, window_params = [{transform_indices = @transform_0, window_bounds = array<i64: 64, 128>}, {pipeline_mode = #tpu.pipeline_mode<synchronous>, transform_indices = @transform_1, window_bounds = array<i64: 128, 128>}, {pipeline_mode = #tpu.pipeline_mode<synchronous>, transform_indices = @transform_2, window_bounds = array<i64: 1, 128>}, {pipeline_mode = #tpu.pipeline_mode<synchronous>, transform_indices = @transform_3, window_bounds = array<i64: 1, 128>}, {pipeline_mode = #tpu.pipeline_mode<synchronous>, transform_indices = @transform_4, window_bounds = array<i64: 1, 128>}, {pipeline_mode = #tpu.pipeline_mode<synchronous>, transform_indices = @transform_5, window_bounds = array<i64: 128, 128>}, {pipeline_mode = #tpu.pipeline_mode<synchronous>, transform_indices = @transform_6, window_bounds = array<i64: 1, 128>}, {pipeline_mode = #tpu.pipeline_mode<synchronous>, transform_indices = @transform_7, window_bounds = array<i64: 1, 128>}, {pipeline_mode = #tpu.pipeline_mode<synchronous>, transform_indices = @transform_8, window_bounds = array<i64: 1, 128>}, {pipeline_mode = #tpu.pipeline_mode<synchronous>, transform_indices = @transform_9, window_bounds = array<i64: 128, 128>}, {pipeline_mode = #tpu.pipeline_mode<synchronous>, transform_indices = @transform_10, window_bounds = array<i64: 1, 128>}, {pipeline_mode = #tpu.pipeline_mode<synchronous>, transform_indices = @transform_11, window_bounds = array<i64: 1, 128>}, {pipeline_mode = #tpu.pipeline_mode<synchronous>, transform_indices = @transform_12, window_bounds = array<i64: 1, 128>}, {transform_indices = @transform_13, window_bounds = array<i64: 64, 128>}]} {
    %c0 = arith.constant 0 : index
    %c0_0 = arith.constant 0 : index
    %0 = vector.load %arg2[%c0, %c0_0] : memref<128x128xbf16, #tpu.memory_space<vmem>>, vector<128x128xbf16>
    %c0_1 = arith.constant 0 : index
    %c0_2 = arith.constant 0 : index
    %1 = vector.load %arg3[%c0_1, %c0_2] : memref<1x128xf32, #tpu.memory_space<vmem>>, vector<1x128xf32>
    %c0_3 = arith.constant 0 : index
    %c0_4 = arith.constant 0 : index
    %2 = vector.load %arg4[%c0_3, %c0_4] : memref<1x128xf32, #tpu.memory_space<vmem>>, vector<1x128xf32>
    %c0_5 = arith.constant 0 : index
    %c0_6 = arith.constant 0 : index
    %3 = vector.load %arg5[%c0_5, %c0_6] : memref<1x128xf32, #tpu.memory_space<vmem>>, vector<1x128xf32>
    %c0_7 = arith.constant 0 : index
    %c0_8 = arith.constant 0 : index
    %4 = vector.load %arg6[%c0_7, %c0_8] : memref<128x128xbf16, #tpu.memory_space<vmem>>, vector<128x128xbf16>
    %c0_9 = arith.constant 0 : index
    %c0_10 = arith.constant 0 : index
    %5 = vector.load %arg7[%c0_9, %c0_10] : memref<1x128xf32, #tpu.memory_space<vmem>>, vector<1x128xf32>
    %c0_11 = arith.constant 0 : index
    %c0_12 = arith.constant 0 : index
    %6 = vector.load %arg8[%c0_11, %c0_12] : memref<1x128xf32, #tpu.memory_space<vmem>>, vector<1x128xf32>
    %c0_13 = arith.constant 0 : index
    %c0_14 = arith.constant 0 : index
    %7 = vector.load %arg9[%c0_13, %c0_14] : memref<1x128xf32, #tpu.memory_space<vmem>>, vector<1x128xf32>
    %c0_15 = arith.constant 0 : index
    %c0_16 = arith.constant 0 : index
    %8 = vector.load %arg10[%c0_15, %c0_16] : memref<128x128xbf16, #tpu.memory_space<vmem>>, vector<128x128xbf16>
    %c0_17 = arith.constant 0 : index
    %c0_18 = arith.constant 0 : index
    %9 = vector.load %arg11[%c0_17, %c0_18] : memref<1x128xf32, #tpu.memory_space<vmem>>, vector<1x128xf32>
    %c0_19 = arith.constant 0 : index
    %c0_20 = arith.constant 0 : index
    %10 = vector.load %arg12[%c0_19, %c0_20] : memref<1x128xf32, #tpu.memory_space<vmem>>, vector<1x128xf32>
    %c0_21 = arith.constant 0 : index
    %c0_22 = arith.constant 0 : index
    %11 = vector.load %arg13[%c0_21, %c0_22] : memref<1x128xf32, #tpu.memory_space<vmem>>, vector<1x128xf32>
    %c0_23 = arith.constant 0 : index
    %c0_24 = arith.constant 0 : index
    %12 = vector.load %arg1[%c0_23, %c0_24] : memref<64x128xbf16, #tpu.memory_space<vmem>>, vector<64x128xbf16>
    %cst = arith.constant dense<0.000000e+00> : vector<64x128xf32>
    %13 = tpu.matmul %12, %0, %cst {dimension_numbers = #tpu.dot_dimension_numbers<[1], [0], [0], [1], [0, 0, 1, 1], [], []>} : vector<64x128xbf16>, vector<128x128xbf16>, vector<64x128xf32> -> vector<64x128xf32>
    %14 = vector.broadcast %1 : vector<1x128xf32> to vector<64x128xf32>
    %15 = arith.addf %13, %14 : vector<64x128xf32>
    %cst_25 = arith.constant dense<0.000000e+00> : vector<64xf32>
    %16 = vector.multi_reduction <add>, %15, %cst_25 [1] : vector<64x128xf32> to vector<64xf32>
    %17 = vector.shape_cast %16 : vector<64xf32> to vector<64x1xf32>
    %18 = arith.mulf %15, %15 : vector<64x128xf32>
    %cst_26 = arith.constant dense<0.000000e+00> : vector<64xf32>
    %19 = vector.multi_reduction <add>, %18, %cst_26 [1] : vector<64x128xf32> to vector<64xf32>
    %20 = vector.shape_cast %19 : vector<64xf32> to vector<64x1xf32>
    %cst_27 = arith.constant 7.812500e-03 : f32
    %21 = vector.broadcast %cst_27 : f32 to vector<64x1xf32>
    %22 = arith.mulf %17, %21 : vector<64x1xf32>
    %cst_28 = arith.constant 7.812500e-03 : f32
    %23 = vector.broadcast %cst_28 : f32 to vector<64x1xf32>
    %24 = arith.mulf %20, %23 : vector<64x1xf32>
    %25 = arith.mulf %22, %22 : vector<64x1xf32>
    %26 = arith.subf %24, %25 : vector<64x1xf32>
    %27 = vector.broadcast %22 : vector<64x1xf32> to vector<64x128xf32>
    %28 = arith.subf %15, %27 : vector<64x128xf32>
    %cst_29 = arith.constant 9.99999974E-6 : f32
    %29 = vector.broadcast %cst_29 : f32 to vector<64x1xf32>
    %30 = arith.addf %26, %29 : vector<64x1xf32>
    %31 = math.rsqrt %30 : vector<64x1xf32>
    %32 = vector.broadcast %31 : vector<64x1xf32> to vector<64x128xf32>
    %33 = arith.mulf %28, %32 : vector<64x128xf32>
    %34 = vector.broadcast %2 : vector<1x128xf32> to vector<64x128xf32>
    %35 = arith.mulf %33, %34 : vector<64x128xf32>
    %36 = vector.broadcast %3 : vector<1x128xf32> to vector<64x128xf32>
    %37 = arith.addf %35, %36 : vector<64x128xf32>
    %cst_30 = arith.constant 0.000000e+00 : f32
    %38 = vector.broadcast %cst_30 : f32 to vector<64x128xf32>
    %39 = arith.maximumf %37, %38 : vector<64x128xf32>
    %40 = arith.truncf %39 : vector<64x128xf32> to vector<64x128xbf16>
    %cst_31 = arith.constant dense<0.000000e+00> : vector<64x128xf32>
    %41 = tpu.matmul %40, %4, %cst_31 {dimension_numbers = #tpu.dot_dimension_numbers<[1], [0], [0], [1], [0, 0, 1, 1], [], []>} : vector<64x128xbf16>, vector<128x128xbf16>, vector<64x128xf32> -> vector<64x128xf32>
    %42 = vector.broadcast %5 : vector<1x128xf32> to vector<64x128xf32>
    %43 = arith.addf %41, %42 : vector<64x128xf32>
    %cst_32 = arith.constant dense<0.000000e+00> : vector<64xf32>
    %44 = vector.multi_reduction <add>, %43, %cst_32 [1] : vector<64x128xf32> to vector<64xf32>
    %45 = vector.shape_cast %44 : vector<64xf32> to vector<64x1xf32>
    %46 = arith.mulf %43, %43 : vector<64x128xf32>
    %cst_33 = arith.constant dense<0.000000e+00> : vector<64xf32>
    %47 = vector.multi_reduction <add>, %46, %cst_33 [1] : vector<64x128xf32> to vector<64xf32>
    %48 = vector.shape_cast %47 : vector<64xf32> to vector<64x1xf32>
    %cst_34 = arith.constant 7.812500e-03 : f32
    %49 = vector.broadcast %cst_34 : f32 to vector<64x1xf32>
    %50 = arith.mulf %45, %49 : vector<64x1xf32>
    %cst_35 = arith.constant 7.812500e-03 : f32
    %51 = vector.broadcast %cst_35 : f32 to vector<64x1xf32>
    %52 = arith.mulf %48, %51 : vector<64x1xf32>
    %53 = arith.mulf %50, %50 : vector<64x1xf32>
    %54 = arith.subf %52, %53 : vector<64x1xf32>
    %55 = vector.broadcast %50 : vector<64x1xf32> to vector<64x128xf32>
    %56 = arith.subf %43, %55 : vector<64x128xf32>
    %cst_36 = arith.constant 9.99999974E-6 : f32
    %57 = vector.broadcast %cst_36 : f32 to vector<64x1xf32>
    %58 = arith.addf %54, %57 : vector<64x1xf32>
    %59 = math.rsqrt %58 : vector<64x1xf32>
    %60 = vector.broadcast %59 : vector<64x1xf32> to vector<64x128xf32>
    %61 = arith.mulf %56, %60 : vector<64x128xf32>
    %62 = vector.broadcast %6 : vector<1x128xf32> to vector<64x128xf32>
    %63 = arith.mulf %61, %62 : vector<64x128xf32>
    %64 = vector.broadcast %7 : vector<1x128xf32> to vector<64x128xf32>
    %65 = arith.addf %63, %64 : vector<64x128xf32>
    %cst_37 = arith.constant 0.000000e+00 : f32
    %66 = vector.broadcast %cst_37 : f32 to vector<64x128xf32>
    %67 = arith.maximumf %65, %66 : vector<64x128xf32>
    %68 = arith.truncf %67 : vector<64x128xf32> to vector<64x128xbf16>
    %cst_38 = arith.constant dense<0.000000e+00> : vector<64x128xf32>
    %69 = tpu.matmul %68, %4, %cst_38 {dimension_numbers = #tpu.dot_dimension_numbers<[1], [0], [0], [1], [0, 0, 1, 1], [], []>} : vector<64x128xbf16>, vector<128x128xbf16>, vector<64x128xf32> -> vector<64x128xf32>
    %70 = vector.broadcast %5 : vector<1x128xf32> to vector<64x128xf32>
    %71 = arith.addf %69, %70 : vector<64x128xf32>
    %cst_39 = arith.constant dense<0.000000e+00> : vector<64xf32>
    %72 = vector.multi_reduction <add>, %71, %cst_39 [1] : vector<64x128xf32> to vector<64xf32>
    %73 = vector.shape_cast %72 : vector<64xf32> to vector<64x1xf32>
    %74 = arith.mulf %71, %71 : vector<64x128xf32>
    %cst_40 = arith.constant dense<0.000000e+00> : vector<64xf32>
    %75 = vector.multi_reduction <add>, %74, %cst_40 [1] : vector<64x128xf32> to vector<64xf32>
    %76 = vector.shape_cast %75 : vector<64xf32> to vector<64x1xf32>
    %cst_41 = arith.constant 7.812500e-03 : f32
    %77 = vector.broadcast %cst_41 : f32 to vector<64x1xf32>
    %78 = arith.mulf %73, %77 : vector<64x1xf32>
    %cst_42 = arith.constant 7.812500e-03 : f32
    %79 = vector.broadcast %cst_42 : f32 to vector<64x1xf32>
    %80 = arith.mulf %76, %79 : vector<64x1xf32>
    %81 = arith.mulf %78, %78 : vector<64x1xf32>
    %82 = arith.subf %80, %81 : vector<64x1xf32>
    %83 = vector.broadcast %78 : vector<64x1xf32> to vector<64x128xf32>
    %84 = arith.subf %71, %83 : vector<64x128xf32>
    %cst_43 = arith.constant 9.99999974E-6 : f32
    %85 = vector.broadcast %cst_43 : f32 to vector<64x1xf32>
    %86 = arith.addf %82, %85 : vector<64x1xf32>
    %87 = math.rsqrt %86 : vector<64x1xf32>
    %88 = vector.broadcast %87 : vector<64x1xf32> to vector<64x128xf32>
    %89 = arith.mulf %84, %88 : vector<64x128xf32>
    %90 = vector.broadcast %6 : vector<1x128xf32> to vector<64x128xf32>
    %91 = arith.mulf %89, %90 : vector<64x128xf32>
    %92 = vector.broadcast %7 : vector<1x128xf32> to vector<64x128xf32>
    %93 = arith.addf %91, %92 : vector<64x128xf32>
    %cst_44 = arith.constant 0.000000e+00 : f32
    %94 = vector.broadcast %cst_44 : f32 to vector<64x128xf32>
    %95 = arith.maximumf %93, %94 : vector<64x128xf32>
    %96 = arith.truncf %95 : vector<64x128xf32> to vector<64x128xbf16>
    %cst_45 = arith.constant dense<0.000000e+00> : vector<64x128xf32>
    %97 = tpu.matmul %96, %8, %cst_45 {dimension_numbers = #tpu.dot_dimension_numbers<[1], [0], [0], [1], [0, 0, 1, 1], [], []>} : vector<64x128xbf16>, vector<128x128xbf16>, vector<64x128xf32> -> vector<64x128xf32>
    %98 = vector.broadcast %9 : vector<1x128xf32> to vector<64x128xf32>
    %99 = arith.addf %97, %98 : vector<64x128xf32>
    %cst_46 = arith.constant dense<0.000000e+00> : vector<64xf32>
    %100 = vector.multi_reduction <add>, %99, %cst_46 [1] : vector<64x128xf32> to vector<64xf32>
    %101 = vector.shape_cast %100 : vector<64xf32> to vector<64x1xf32>
    %102 = arith.mulf %99, %99 : vector<64x128xf32>
    %cst_47 = arith.constant dense<0.000000e+00> : vector<64xf32>
    %103 = vector.multi_reduction <add>, %102, %cst_47 [1] : vector<64x128xf32> to vector<64xf32>
    %104 = vector.shape_cast %103 : vector<64xf32> to vector<64x1xf32>
    %cst_48 = arith.constant 1.000000e-01 : f32
    %105 = vector.broadcast %cst_48 : f32 to vector<64x1xf32>
    %106 = arith.mulf %101, %105 : vector<64x1xf32>
    %cst_49 = arith.constant 1.000000e-01 : f32
    %107 = vector.broadcast %cst_49 : f32 to vector<64x1xf32>
    %108 = arith.mulf %104, %107 : vector<64x1xf32>
    %109 = arith.mulf %106, %106 : vector<64x1xf32>
    %110 = arith.subf %108, %109 : vector<64x1xf32>
    %111 = vector.broadcast %106 : vector<64x1xf32> to vector<64x128xf32>
    %112 = arith.subf %99, %111 : vector<64x128xf32>
    %cst_50 = arith.constant 9.99999974E-6 : f32
    %113 = vector.broadcast %cst_50 : f32 to vector<64x1xf32>
    %114 = arith.addf %110, %113 : vector<64x1xf32>
    %115 = math.rsqrt %114 : vector<64x1xf32>
    %116 = vector.broadcast %115 : vector<64x1xf32> to vector<64x128xf32>
    %117 = arith.mulf %112, %116 : vector<64x128xf32>
    %118 = vector.broadcast %10 : vector<1x128xf32> to vector<64x128xf32>
    %119 = arith.mulf %117, %118 : vector<64x128xf32>
    %120 = vector.broadcast %11 : vector<1x128xf32> to vector<64x128xf32>
    %121 = arith.addf %119, %120 : vector<64x128xf32>
    %c0_51 = arith.constant 0 : index
    %c0_52 = arith.constant 0 : index
    %122 = vector.load %arg14[%c0_51, %c0_52] : memref<64x128xf32, #tpu.memory_space<vmem>>, vector<64x128xf32>
    tpu.vector_store %arg14[%c0_51, %c0_52], %121 {strides = array<i32>} : memref<64x128xf32, #tpu.memory_space<vmem>>, vector<64x128xf32>,
    return
  }
  func.func @transform_0(%arg0: i32) -> (i32, i32) {
    %c0_i32 = arith.constant 0 : i32
    %c0_i32_0 = arith.constant 0 : i32
    return %arg0, %c0_i32 : i32, i32
  }
  func.func @transform_1(%arg0: i32) -> (i32, i32) {
    %c0_i32 = arith.constant 0 : i32
    %c0_i32_0 = arith.constant 0 : i32
    %c0_i32_1 = arith.constant 0 : i32
    return %c0_i32, %c0_i32_0 : i32, i32
  }
  func.func @transform_2(%arg0: i32) -> (i32, i32) {
    %c0_i32 = arith.constant 0 : i32
    %c0_i32_0 = arith.constant 0 : i32
    %c0_i32_1 = arith.constant 0 : i32
    return %c0_i32, %c0_i32_0 : i32, i32
  }
  func.func @transform_3(%arg0: i32) -> (i32, i32) {
    %c0_i32 = arith.constant 0 : i32
    %c0_i32_0 = arith.constant 0 : i32
    %c0_i32_1 = arith.constant 0 : i32
    return %c0_i32, %c0_i32_0 : i32, i32
  }
  func.func @transform_4(%arg0: i32) -> (i32, i32) {
    %c0_i32 = arith.constant 0 : i32
    %c0_i32_0 = arith.constant 0 : i32
    %c0_i32_1 = arith.constant 0 : i32
    return %c0_i32, %c0_i32_0 : i32, i32
  }
  func.func @transform_5(%arg0: i32) -> (i32, i32) {
    %c0_i32 = arith.constant 0 : i32
    %c0_i32_0 = arith.constant 0 : i32
    %c0_i32_1 = arith.constant 0 : i32
    return %c0_i32, %c0_i32_0 : i32, i32
  }
  func.func @transform_6(%arg0: i32) -> (i32, i32) {
    %c0_i32 = arith.constant 0 : i32
    %c0_i32_0 = arith.constant 0 : i32
    %c0_i32_1 = arith.constant 0 : i32
    return %c0_i32, %c0_i32_0 : i32, i32
  }
  func.func @transform_7(%arg0: i32) -> (i32, i32) {
    %c0_i32 = arith.constant 0 : i32
    %c0_i32_0 = arith.constant 0 : i32
    %c0_i32_1 = arith.constant 0 : i32
    return %c0_i32, %c0_i32_0 : i32, i32
  }
  func.func @transform_8(%arg0: i32) -> (i32, i32) {
    %c0_i32 = arith.constant 0 : i32
    %c0_i32_0 = arith.constant 0 : i32
    %c0_i32_1 = arith.constant 0 : i32
    return %c0_i32, %c0_i32_0 : i32, i32
  }
  func.func @transform_9(%arg0: i32) -> (i32, i32) {
    %c0_i32 = arith.constant 0 : i32
    %c0_i32_0 = arith.constant 0 : i32
    %c0_i32_1 = arith.constant 0 : i32
    return %c0_i32, %c0_i32_0 : i32, i32
  }
  func.func @transform_10(%arg0: i32) -> (i32, i32) {
    %c0_i32 = arith.constant 0 : i32
    %c0_i32_0 = arith.constant 0 : i32
    %c0_i32_1 = arith.constant 0 : i32
    return %c0_i32, %c0_i32_0 : i32, i32
  }
  func.func @transform_11(%arg0: i32) -> (i32, i32) {
    %c0_i32 = arith.constant 0 : i32
    %c0_i32_0 = arith.constant 0 : i32
    %c0_i32_1 = arith.constant 0 : i32
    return %c0_i32, %c0_i32_0 : i32, i32
  }
  func.func @transform_12(%arg0: i32) -> (i32, i32) {
    %c0_i32 = arith.constant 0 : i32
    %c0_i32_0 = arith.constant 0 : i32
    %c0_i32_1 = arith.constant 0 : i32
    return %c0_i32, %c0_i32_0 : i32, i32
  }
  func.func @transform_13(%arg0: i32) -> (i32, i32) {
    %c0_i32 = arith.constant 0 : i32
    %c0_i32_0 = arith.constant 0 : i32
    return %arg0, %c0_i32 : i32, i32
  }
}

</mosaic_0001>

<bundles_post_ra>
// kernel: tpu_custom_call.1
= control target key start
LH: loop header
LB: loop body
LE: loop exit
PB: predicated region body
PF: predicated region fallthrough
CT: control target
= control target key end

     0   :  { %s2991_s0 = inlined_call_operand.hbm [shape: bf16[256,128], index: 0, kind: input, shape index: {}]   ;;  %s2992_s1 = inlined_call_operand.hbm [shape: bf16[128,128], index: 1, kind: input, shape index: {}]   ;;  %s2993_s2 = inlined_call_operand.vmem [shape: f32[1,128], index: 2, kind: input, shape index: {}]   ;;  %s2994_s3 = inlined_call_operand.vmem [shape: f32[1,128], index: 3, kind: input, shape index: {}]   ;;  %s2995_s4 = inlined_call_operand.vmem [shape: f32[1,128], index: 4, kind: input, shape index: {}]   ;;  %s2996_s5 = inlined_call_operand.hbm [shape: bf16[128,128], index: 5, kind: input, shape index: {}]   ;;  %s2997_s6 = inlined_call_operand.vmem [shape: f32[1,128], index: 6, kind: input, shape index: {}]   ;;  %s2998_s7 = inlined_call_operand.vmem [shape: f32[1,128], index: 7, kind: input, shape index: {}]   ;;  %s2999_s8 = inlined_call_operand.vmem [shape: f32[1,128], index: 8, kind: input, shape index: {}]   ;;  %s3000_s9 = inlined_call_operand.hbm [shape: bf16[128,128], index: 9, kind: input, shape index: {}]   ;;  %s3001_s10 = inlined_call_operand.vmem [shape: f32[1,128], index: 10, kind: input, shape index: {}]   ;;  %s3002_s11 = inlined_call_operand.vmem [shape: f32[1,128], index: 11, kind: input, shape index: {}]   ;;  %s3003_s12 = inlined_call_operand.vmem [shape: f32[1,128], index: 12, kind: input, shape index: {}]   ;;  %s3004_s13 = inlined_call_operand.hbm [shape: f32[256,128], index: 13, kind: output, shape index: {}]  }
   0x1   :  { %3010 = sst [smem:[#allocation19_spill]] %s2992_s1 }
   0x2   :  { %3011 = sst [smem:[#allocation20_spill]] %s2996_s5 }
   0x3   :  { %3012 = sst [smem:[#allocation21_spill]] %s3000_s9 }
   0x4   :  { %18 = vsyncpa [#allocation3], 0 }
   0x5   :  { %20 = vsyncpa [#allocation3 + $0x1], 0 }
   0x6   :  { %21 = vsyncpa [#allocation6], 0 }
   0x7   :  { %22 = vsyncpa [#allocation9], 0 }
   0x8   :  { %23 = vsyncpa [#allocation4], 0 }
   0x9   :  { %25 = vsyncpa [#allocation4 + $0x1], 0  ;;  %s2408_s25 = smov 0   ;;  %s2410_s26 = smov 0  }
   0xa   :  { %s2412_s27 = smov 0   ;;  %s2414_s28 = smov 0  }
   0xb LB: > { %3013 = sst [smem:[#allocation15_spill]] %s2317_s25  ;;  %s2429_s29 = sadd.s32 4294967295, %s2329_s28   ;;  %s2329_s28 = sphi %s2414_s28, %s3035_s28   ;;  %s2325_s27 = sphi %s2412_s27, %s3034_s27   ;;  %s2321_s26 = sphi %s2410_s26, %s3033_s26   ;;  %s2317_s25 = sphi %s2408_s25, %s3032_s25  }
   0xc   : > { %3014 = sst [smem:[#allocation16_spill]] %s2325_s27  ;;  %s1819_s30 = sadd.s32 4294967294, %s2329_s28  }
   0xd   : > { %p51_p0 = scmp.ne.s32.totalorder %s2321_s26, %s2317_s25  ;;  %p52_p1 = scmp.eq.s32.totalorder %s2429_s29, 0 }
   0xe   : > { %p327_p2 = scmp.eq.s32.totalorder %s2429_s29, 3  ;;  %p333_p3 = scmp.eq.s32.totalorder %s1819_s30, 3 }
   0xf   : > { %p2438_p4 = por %p52_p1, %p51_p0  ;;  %p1820_p5 = scmp.ge.s32.totalorder %s2329_s28, 1 }
  0x10   : > { %p2443_p6 = por %p333_p3, %p51_p0  ;;  %p340_p7 = scmp.lt.s32.totalorder %s2329_s28, 5 }
  0x11   : > { %s3018_s1 = sld [smem:[#allocation19_spill]]  ;;  %s2331_s20 = smov [#allocation5]  }
  0x12   : > { %s3016_s15 = scalar_select %p2443_p6, 1, 0 }
  0x13   : > { %p2451_p8 = pnand %p1820_p5, %p340_p7  ;;  %s353_s21 = sshll.u32 %s2331_s20, 4  ;;  %s354_s21 = int_to_ptr.vmem [resolvable:$true] %s353_s21 }
  0x14   : > { %3017 = sst [smem:[#allocation17_spill]] %s3016_s15  ;;  %s3007_s16 = smov 64  }
  0x15   : > { %p1997_p9 = pneg %p2451_p8  ;;  %s3021_s5 = sld [smem:[#allocation20_spill]] }
  0x16   : > { %s3008_s17 = smov 4   ;;  %s2334_s20 = smov [#allocation7]  }
  0x17   : > { %s351_s18 = sshll.u32 %s3018_s1, 4  ;;  %p2459_p10 = pnand %p1997_p9, %p52_p1  ;;  %s352_s18 = int_to_ptr.hbm [resolvable:$true] %s351_s18 }
  0x18   : > { %s376_s23 = sshll.u32 %s2334_s20, 4  ;;  %s3022_s9 = sld [smem:[#allocation21_spill]]  ;;  %s377_s23 = int_to_ptr.vmem [resolvable:$true] %s376_s23 }
  0x19   : > { %2000 = dma.hbm_to_vmem [thread:$0]  (!%p2459_p10), %s352_s18, 1024, %s354_s21, [#allocation6], %s3007_s16, %s3007_s16, %s3008_s17  }
  0x1a   : > { %s2335_s18 = smov [#allocation8]   ;;  %s2480_s15 = sadd.s32 1, %s2329_s28  }
  0x1b   : > { %s374_s30 = sshll.u32 %s3021_s5, 4  ;;  %s399_s21 = sshll.u32 %s2335_s18, 4  ;;  %s375_s30 = int_to_ptr.hbm [resolvable:$true] %s374_s30  ;;  %s400_s21 = int_to_ptr.vmem [resolvable:$true] %s399_s21 }
  0x1c   : > { %2003 = dma.hbm_to_vmem [thread:$0]  (!%p2459_p10), %s375_s30, 1024, %s377_s23, [#allocation6], %s3007_s16, %s3007_s16, %s3008_s17  }
  0x1d   : > { %s35_s1 = ssub.s32 %s2329_s28, %s2480_s15  ;;  %s38_s20 = sadd.s32 1, %s2325_s27 }
  0x1e   : > { %s397_s5 = sshll.u32 %s3022_s9, 4  ;;  %p36_p11 = scmp.eq.s32.totalorder %s35_s1, 0  ;;  %s398_s5 = int_to_ptr.hbm [resolvable:$true] %s397_s5 }
  0x1f   : > { %2006 = dma.hbm_to_vmem [thread:$0]  (!%p2459_p10), %s398_s5, 1024, %s400_s21, [#allocation9], %s3007_s16, %s3007_s16, %s3008_s17  }
  0x20   : > { %p45_p12 = scmp.ne.s32.totalorder %s2325_s27, %s2321_s26  ;;  %p46_p13 = scmp.eq.s32.totalorder %s2329_s28, 0 }
  0x21   : > { %s2494_s24 = scalar_select %p36_p11, %s2325_s27, %s38_s20  }
  0x22   : > { %p2498_p0 = por %p327_p2, %p45_p12  ;;  %p2018_p3 = scmp.lt.s32.totalorder %s2329_s28, 4 }
  0x23   : > { %3023 = sst [smem:[#allocation18_spill]] %s2494_s24  ;;  %s422_s23 = sand.u32 1, %s2325_s27  }
  0x24   : > { %s1951_s22 = sshll.u32 %s2329_s28, 5  ;;  %p47_p5 = por %p46_p13, %p45_p12 }
  0x25   : > { %s1825_s18 = sshll.u32 %s422_s23, 5  ;;  %s431_s5 = scalar_lea.hbm %s2991_s0, %s1951_s22 }
  0x26   : > { %s432_s21 = sshll.u32 %s431_s5, 4  ;;  %s426_s1 = scalar_lea.vmem [#allocation2], %s1825_s18  ;;  %s433_s21 = int_to_ptr.hbm [resolvable:$true] %s432_s21 }
  0x27   : > { %s434_s16 = sshll.u32 %s426_s1, 4  ;;  %p2508_p7 = pnand %p2018_p3, %p47_p5  ;;  %s435_s16 = int_to_ptr.vmem [resolvable:$true] %s434_s16 }
  0x28   : > { %s423_s17 = scalar_lea.sflag [#allocation3], %s422_s23  ;;  %s2225_s24 = sshra.s32 %s433_s21, 4  ;;  %s2226_s24 = int_to_ptr.hbm [resolvable:$true] %s2225_s24 }
  0x29   : > { %s2227_s27 = scalar_lea.hbm %s2226_s24, 32  ;;  %p2229_p9 = pneg %p2508_p7 }
  0x2a   : > { %p2228_p2 = scmp.ne.s32.totalorder %s2226_s24, %s2227_s27  ;;  %s2232_s22 = scalar_lea.hbm %s2991_s0, 128 }
  0x2b   : > { %p2233_p12 = scmp.lt.s32.totalorder %s2226_s24, %s2991_s0  ;;  %p2234_p13 = scmp.lt.s32.totalorder %s2232_s22, %s2227_s27 }
  0x2c   : > { %p2230_p10 = pnand %p2229_p9, %p2228_p2 }
  0x2d   : > { %p2235_p3 = por %p2234_p13, %p2233_p12 }
  0x2e   : > { %p2231_p11 = pneg %p2230_p10 }
  0x30   : > { %p2236_p5 = pnand %p2235_p3, %p2231_p11 }
  0x32   : > { %2239 = shalt.err (!%p2236_p5)
}
  0x33   : > { %s3026_s23 = smov 4   ;;  %s3027_s1 = smov 64  }
  0x34   : > { %2010 = dma.hbm_to_vmem [thread:$0]  (!%p2508_p7), %s433_s21, 512, %s435_s16, %s423_s17, %s3027_s1, %s3027_s1, %s3026_s23  }
  0x35   : > { %446 = sbr.rel (%p2451_p8) target bundleno = 1313 (0x521), region = 72  ;;  %s2528_s9 = sand.u32 (!%p2451_p8), 1, %s2321_s26  }
  0x36   : > { %s1829_s24 = sshll.u32 (!%p2451_p8), %s2528_s9, 5  ;;  %s449_s27 = scalar_lea.sflag (!%p2451_p8), [#allocation3], %s2528_s9 }
  0x37   : > { %s452_s25 = scalar_lea.vmem (!%p2451_p8), [#allocation2], %s1829_s24 }
  0x3a   : > { %2300 = dma.done.wait (%p2438_p4), %s449_s27, 512  }
  0x3b   : > { %2302 = vsyncadd (%p2438_p4), %s449_s27, 4294966784 }
  0x3c   : > { %2304 = dma.done.wait (%p52_p1), [#allocation6], 2048  }
  0x3d   : > { %2306 = vsyncadd (%p52_p1), [#allocation6], 4294965248 }
  0x3e   : > { %2308 = dma.done.wait (%p52_p1), [#allocation9], 1024  }
  0x3f   : > { %2310 = vsyncadd (%p52_p1), [#allocation9], 4294966272  ;;  %v1959_v0 = vld [vmem:[#allocation5 + $0x38] sm:$0xff]  ;;  %v1958_v1 = vld [vmem:[#allocation5 + $0x30] sm:$0xff]  ;;  %s1833_s16 = sshll.u32 %s2528_s9, 6  ;;  %s1980_s22 = sshll.u32 %s2429_s29, 6 }
  0x40   : > { %653 = vmatpush.bf16.msra.mxu0 %v1959_v0  ;;  %v1957_v2 = vld [vmem:[#allocation5 + $0x28] sm:$0xff]  ;;  %v1956_v3 = vld [vmem:[#allocation5 + $0x20] sm:$0xff]  ;;  %v1955_v4 = vld [vmem:[#allocation5 + $0x18] sm:$0xff]  ;;  %s2920_s20 = scalar_lea.vmem [#allocation10], %s1833_s16  ;;  %s1713_s23 = scalar_lea.hbm %s3004_s13, %s1980_s22 }
  0x41   : > { %v1954_v5 = vld [vmem:[#allocation5 + $0x10] sm:$0xff]  ;;  %v1953_v6 = vld [vmem:[#allocation5 + $0x8] sm:$0xff]  ;;  %v1952_v7 = vld [vmem:[#allocation5] sm:$0xff]  ;;  %s1714_s29 = sshll.u32 %s2920_s20, 4  ;;  %s1716_s1 = sshll.u32 %s1713_s23, 4  ;;  %s1715_s29 = int_to_ptr.vmem [resolvable:$true] %s1714_s29  ;;  %s1717_s1 = int_to_ptr.hbm [resolvable:$true] %s1716_s1 }
  0x42   : > { %v1976_v8 = vld [vmem:[%s452_s25] sm:$0xff]  ;;  %v1977_v9 = vld [vmem:[%s452_s25 + $0x8] sm:$0xff]  ;;  %v1978_v10 = vld [vmem:[%s452_s25 + $0x10] sm:$0xff]  ;;  %s1702_s24 = scalar_lea.sflag [#allocation4], %s2528_s9  ;;  %s2269_s27 = sshra.s32 %s1717_s1, 4  ;;  %s2270_s27 = int_to_ptr.hbm [resolvable:$true] %s2269_s27 }
  0x43   : > { %v1979_v11 = vld [vmem:[%s452_s25 + $0x18] sm:$0xff]  ;;  %v2062_v12 = vld [vmem:[%s2993_s2] ss:$0 sm:$0xff]  ;;  %v1966_v38 = vld [vmem:[#allocation7 + $0x30] sm:$0xff]  ;;  %s2271_s25 = scalar_lea.hbm %s2270_s27, 64  ;;  %s2275_s16 = scalar_lea.hbm %s3004_s13, 256 }
  0x44   : > { %654 = vmatpush.bf16.msra.mxu0 %v1958_v1  ;;  %v1967_v37 = vld [vmem:[#allocation7 + $0x38] sm:$0xff]  ;;  %v1965_v39 = vld [vmem:[#allocation7 + $0x28] sm:$0xff]  ;;  %v1964_v40 = vld [vmem:[#allocation7 + $0x20] sm:$0xff]  ;;  %p2272_p1 = scmp.ne.s32.totalorder %s2270_s27, %s2271_s25  ;;  %p2276_p7 = scmp.lt.s32.totalorder %s2270_s27, %s3004_s13 }
  0x45   : > { %943 = vmatpush.bf16.msra.mxu1 %v1967_v37  ;;  %1182 = vmatpush.bf16.msra.mxu2 %v1967_v37  ;;  %v1963_v41 = vld [vmem:[#allocation7 + $0x18] sm:$0xff]  ;;  %v1962_v43 = vld [vmem:[#allocation7 + $0x10] sm:$0xff]  ;;  %v1961_v48 = vld [vmem:[#allocation7 + $0x8] sm:$0xff]  ;;  %p2277_p2 = scmp.lt.s32.totalorder %s2275_s16, %s2271_s25 }
  0x46   : > { %v1960_v52 = vld [vmem:[#allocation7] sm:$0xff]  ;;  %p2273_p4 = pnand %p2272_p1, %p2498_p0 }
  0x47   : > { %p2278_p9 = por %p2277_p2, %p2276_p7 }
  0x48   : > { %655 = vmatpush.bf16.msra.mxu0 %v1957_v2  ;;  %p2274_p8 = pneg %p2273_p4 }
  0x49   : > { %944 = vmatpush.bf16.msra.mxu1 %v1966_v38  ;;  %1183 = vmatpush.bf16.msra.mxu2 %v1966_v38  ;;  %v2608_v38 = vld [vmem:[%s2995_s4] ss:$0 sm:$0xff] }
  0x4a   : > { %p2279_p10 = pnand %p2278_p9, %p2274_p8 }
  0x4c   : > { %656 = vmatpush.bf16.msra.mxu0 %v1956_v3 }
  0x4d   : > { %945 = vmatpush.bf16.msra.mxu1 %v1965_v39  ;;  %1184 = vmatpush.bf16.msra.mxu2 %v1965_v39 }
  0x50   : > { %657 = vmatpush.bf16.msra.mxu0 %v1955_v4 }
  0x51   : > { %946 = vmatpush.bf16.msra.mxu1 %v1964_v40  ;;  %1185 = vmatpush.bf16.msra.mxu2 %v1964_v40 }
  0x54   : > { %658 = vmatpush.bf16.msra.mxu0 %v1954_v5 }
  0x55   : > { %947 = vmatpush.bf16.msra.mxu1 %v1963_v41  ;;  %1186 = vmatpush.bf16.msra.mxu2 %v1963_v41 }
  0x58   : > { %659 = vmatpush.bf16.msra.mxu0 %v1953_v6 }
  0x59   : > { %948 = vmatpush.bf16.msra.mxu1 %v1962_v43  ;;  %1187 = vmatpush.bf16.msra.mxu2 %v1962_v43 }
  0x5c   : > { %660 = vmatpush.bf16.msra.mxu0 %v1952_v7 }
  0x5d   : > { %949 = vmatpush.bf16.msra.mxu1 %v1961_v48  ;;  %1188 = vmatpush.bf16.msra.mxu2 %v1961_v48 }
  0x5f   : > { %661 = vmatmul.bf16.vlgmr.msra.gmra.mxu0 %v1976_v8 }
  0x61   : > { %950 = vmatpush.bf16.msra.mxu1 %v1960_v52  ;;  %1189 = vmatpush.bf16.msra.mxu2 %v1960_v52 }
  0x6f   : > { %666 = vmatmul.bf16.gmra.mxu0 %v1977_v9 }
  0x7f   : > { %671 = vmatmul.bf16.gmra.mxu0 %v1978_v10 }
  0x8f   : > { %676 = vmatmul.bf16.gmra.mxu0 %v1979_v11 }
  0xdc   : > { %v662_v13 = vpop.f32.mrf.mxu0 }
  0xdd   : > { %v2547_v14 = vadd.f32 %v2062_v12, %v662_v13 }
  0xdf   : > { %682 = vadd.xlane.f32.xlu0 %v2547_v14  ;;  %v698_v15 = vmul.f32 %v2547_v14, %v2547_v14 }
  0xe1   : > { %706 = vadd.xlane.f32.xlu1 %v698_v15 }
  0xe4   : > { %v664_v16 = vpop.f32.mrf.mxu0 }
  0xe5   : > { %v2552_v17 = vadd.f32 %v2062_v12, %v664_v16 }
  0xe7   : > { %684 = vadd.xlane.f32.xlu0 %v2552_v17  ;;  %v699_v18 = vmul.f32 %v2552_v17, %v2552_v17 }
  0xe9   : > { %708 = vadd.xlane.f32.xlu1 %v699_v18 }
  0xec   : > { %v667_v19 = vpop.f32.mrf.mxu0 }
  0xed   : > { %v2557_v20 = vadd.f32 %v2062_v12, %v667_v19 }
  0xef   : > { %686 = vadd.xlane.f32.xlu2 %v2557_v20  ;;  %v700_v21 = vmul.f32 %v2557_v20, %v2557_v20 }
  0xf1   : > { %710 = vadd.xlane.f32.xlu0 %v700_v21 }
  0xf4   : > { %v669_v22 = vpop.f32.mrf.mxu0 }
  0xf5   : > { %v2562_v23 = vadd.f32 %v2062_v12, %v669_v22 }
  0xf7   : > { %688 = vadd.xlane.f32.xlu2 %v2562_v23  ;;  %v701_v24 = vmul.f32 %v2562_v23, %v2562_v23 }
  0xf9   : > { %712 = vadd.xlane.f32.xlu1 %v701_v24 }
  0xfc   : > { %v672_v25 = vpop.f32.mrf.mxu0 }
  0xfd   : > { %v2567_v26 = vadd.f32 %v2062_v12, %v672_v25  ;;  %v2599_v25 = vld [vmem:[%s2994_s3] ss:$0 sm:$0xff] }
  0xff   : > { %690 = vadd.xlane.f32.xlu2 %v2567_v26  ;;  %v702_v27 = vmul.f32 %v2567_v26, %v2567_v26 }
 0x101   : > { %714 = vadd.xlane.f32.xlu1 %v702_v27 }
 0x104   : > { %v674_v28 = vpop.f32.mrf.mxu0 }
 0x105   : > { %v2572_v29 = vadd.f32 %v2062_v12, %v674_v28 }
 0x107   : > { %692 = vadd.xlane.f32.xlu0 %v2572_v29  ;;  %v703_v30 = vmul.f32 %v2572_v29, %v2572_v29 }
 0x109   : > { %716 = vadd.xlane.f32.xlu2 %v703_v30 }
 0x10c   : > { %v677_v31 = vpop.f32.mrf.mxu0 }
 0x10d   : > { %v2577_v32 = vadd.f32 %v2062_v12, %v677_v31 }
 0x10f   : > { %694 = vadd.xlane.f32.xlu0 %v2577_v32  ;;  %v704_v33 = vmul.f32 %v2577_v32, %v2577_v32 }
 0x111   : > { %718 = vadd.xlane.f32.xlu2 %v704_v33 }
 0x114   : > { %v679_v34 = vpop.f32.mrf.mxu0 }
 0x115   : > { %v2582_v35 = vadd.f32 %v2062_v12, %v679_v34 }
 0x117   : > { %696 = vadd.xlane.f32.xlu1 %v2582_v35  ;;  %v705_v36 = vmul.f32 %v2582_v35, %v2582_v35 }
 0x119   : > { %720 = vadd.xlane.f32.xlu0 %v705_v36 }
 0x152   : > { %v683_v42 = vpop.xlane.xlu0 %682 }
 0x153   : > { %v722_v44 = vmul.f32 0.0078125, %v683_v42 }
 0x154   : > { %v707_v45 = vpop.xlane.xlu1 %706 }
 0x155   : > { %v738_v46 = vmul.f32 %v722_v44, %v722_v44  ;;  %v730_v47 = vmul.f32 0.0078125, %v707_v45  ;;  %v754_v16 = vsub.f32 %v2547_v14, %v722_v44 }
 0x157   : > { %v746_v49 = vsub.f32 %v730_v47, %v738_v46 }
 0x159   : > { %v762_v50 = vadd.f32 1e-05, %v746_v49 }
 0x15a   : > { %v685_v51 = vpop.xlane.xlu0 %684 }
 0x15b   : > { %2071 = vrsqrt.f32 %v762_v50  ;;  %v723_v53 = vmul.f32 0.0078125, %v685_v51  ;;  %vm776_vm1 = vweird.f32 %v762_v50 }
 0x15c   : > { %v709_v54 = vpop.xlane.xlu1 %708 }
 0x15d   : > { %v739_v55 = vmul.f32 %v723_v53, %v723_v53  ;;  %v731_v56 = vmul.f32 0.0078125, %v709_v54  ;;  %v755_v34 = vsub.f32 %v2552_v17, %v723_v53 }
 0x15f   : > { %v747_v57 = vsub.f32 %v731_v56, %v739_v55 }
 0x161   : > { %v2072_v58 = vpop.eup %2071  ;;  %v763_v59 = vadd.f32 1e-05, %v747_v57 }
 0x162   : > { %v771_v60 = vmul.f32 %v2072_v58, %v762_v50  ;;  %v687_v61 = vpop.xlane.xlu2 %686  ;;  %vm777_vm0 = vweird.f32 %v2072_v58 }
 0x163   : > { %2073 = vrsqrt.f32 %v763_v59  ;;  %v2587_v62 = vmul.f32 0.0078125, %v687_v61  ;;  %vm778_vm2 = vmor %vm776_vm1, %vm777_vm0  ;;  %vm786_vm4 = vweird.f32 %v763_v59 }
 0x164   : > { %v772_v63 = vmul.f32 %v2072_v58, %v771_v60  ;;  %v711_v0 = vpop.xlane.xlu0 %710 }
 0x165   : > { %v740_v1 = vmul.f32 %v2587_v62, %v2587_v62  ;;  %v732_v2 = vmul.f32 0.0078125, %v711_v0  ;;  %v756_v61 = vsub.f32 %v2557_v20, %v2587_v62 }
 0x166   : > { %v773_v3 = vmul.f32 0.5, %v772_v63 }
 0x167   : > { %v748_v4 = vsub.f32 %v732_v2, %v740_v1 }
 0x168   : > { %v774_v5 = vsub.f32 1.5, %v773_v3 }
 0x169   : > { %v2074_v6 = vpop.eup %2073  ;;  %v764_v7 = vadd.f32 1e-05, %v748_v4 }
 0x16a   : > { %v775_v8 = vmul.f32 %v2072_v58, %v774_v5  ;;  %v781_v9 = vmul.f32 %v2074_v6, %v763_v59  ;;  %v689_v10 = vpop.xlane.xlu2 %688  ;;  %vm787_vm3 = vweird.f32 %v2074_v6 }
 0x16b   : > { %2075 = vrsqrt.f32 %v764_v7  ;;  %v2591_v11 = vmul.f32 0.0078125, %v689_v10  ;;  %vm788_vm5 = vmor %vm786_vm4, %vm787_vm3  ;;  %vm796_vm7 = vweird.f32 %v764_v7 }
 0x16c   : > { %v782_v12 = vmul.f32 %v2074_v6, %v781_v9  ;;  %v713_v13 = vpop.xlane.xlu1 %712  ;;  %v779_v15 = vsel %vm778_vm2, %v2072_v58, %v775_v8 }
 0x16d   : > { %v741_v18 = vmul.f32 %v2591_v11, %v2591_v11  ;;  %v733_v19 = vmul.f32 0.0078125, %v713_v13  ;;  %v850_v24 = vmul.f32 %v779_v15, %v754_v16  ;;  %v757_v20 = vsub.f32 %v2562_v23, %v2591_v11 }
 0x16e   : > { %v783_v21 = vmul.f32 0.5, %v782_v12 }
 0x16f   : > { %v749_v22 = vsub.f32 %v733_v19, %v741_v18  ;;  %v861_v37 = vmul.f32 %v2599_v25, %v850_v24 }
 0x170   : > { %v784_v27 = vsub.f32 1.5, %v783_v21 }
 0x171   : > { %v2076_v28 = vpop.eup %2075  ;;  %v765_v30 = vadd.f32 1e-05, %v749_v22  ;;  %v872_v47 = vadd.f32 %v2608_v38, %v861_v37 }
 0x172   : > { %v785_v31 = vmul.f32 %v2074_v6, %v784_v27  ;;  %v791_v33 = vmul.f32 %v2076_v28, %v764_v7  ;;  %v691_v14 = vpop.xlane.xlu2 %690  ;;  %vm797_vm6 = vweird.f32 %v2076_v28 }
 0x173   : > { %2077 = vrsqrt.f32 %v765_v30  ;;  %v2602_v36 = vmul.f32 0.0078125, %v691_v14  ;;  %vm798_vm8 = vmor %vm796_vm7, %vm797_vm6  ;;  %v880_v56 = vmax.f32 %v872_v47, 0.0  ;;  %vm806_vm10 = vweird.f32 %v765_v30 }
 0x174   : > { %v792_v39 = vmul.f32 %v2076_v28, %v791_v33  ;;  %v715_v40 = vpop.xlane.xlu1 %714  ;;  %v789_v41 = vsel %vm788_vm5, %v2074_v6, %v785_v31 }
 0x175   : > { %v742_v42 = vmul.f32 %v2602_v36, %v2602_v36  ;;  %v734_v43 = vmul.f32 0.0078125, %v715_v40  ;;  %v851_v44 = vmul.f32 %v789_v41, %v755_v34 }
 0x176   : > { %v793_v17 = vmul.f32 0.5, %v792_v39 }
 0x177   : > { %v750_v45 = vsub.f32 %v734_v43, %v742_v42  ;;  %v862_v46 = vmul.f32 %v2599_v25, %v851_v44  ;;  %v758_v44 = vsub.f32 %v2567_v26, %v2602_v36 }
 0x178   : > { %v794_v48 = vsub.f32 1.5, %v793_v17 }
 0x179   : > { %v2078_v49 = vpop.eup %2077  ;;  %v766_v50 = vadd.f32 1e-05, %v750_v45  ;;  %v873_v51 = vadd.f32 %v2608_v38, %v862_v46 }
 0x17a   : > { %v795_v52 = vmul.f32 %v2076_v28, %v794_v48  ;;  %v801_v53 = vmul.f32 %v2078_v49, %v765_v30  ;;  %v693_v54 = vpop.xlane.xlu0 %692  ;;  %vm807_vm9 = vweird.f32 %v2078_v49 }
 0x17b   : > { %2079 = vrsqrt.f32 %v766_v50  ;;  %v2615_v55 = vmul.f32 0.0078125, %v693_v54  ;;  %v881_v57 = vmax.f32 %v873_v51, 0.0  ;;  %vm808_vm11 = vmor %vm806_vm10, %vm807_vm9  ;;  %vm816_vm13 = vweird.f32 %v766_v50 }
 0x17c   : > { %v802_v58 = vmul.f32 %v2078_v49, %v801_v53  ;;  %v717_v59 = vpop.xlane.xlu2 %716  ;;  %v799_v60 = vsel %vm798_vm8, %v2076_v28, %v795_v52 }
 0x17d   : > { %v743_v63 = vmul.f32 %v2615_v55, %v2615_v55  ;;  %v735_v0 = vmul.f32 0.0078125, %v717_v59  ;;  %v888_v1 = vpack.c.bf16 %v881_v57, %v880_v56  ;;  %v852_v4 = vmul.f32 %v799_v60, %v756_v61 }
 0x17e   : > { %v803_v2 = vmul.f32 0.5, %v802_v58  ;;  %v759_v56 = vsub.f32 %v2572_v29, %v2615_v55 }
 0x17f   : > { %v751_v3 = vsub.f32 %v735_v0, %v743_v63  ;;  %951 = vmatmul.bf16.vlgmr.msra.gmra.mxu1 %v888_v1  ;;  %v863_v12 = vmul.f32 %v2599_v25, %v852_v4 }
 0x180   : > { %v804_v5 = vsub.f32 1.5, %v803_v2 }
 0x181   : > { %v2080_v6 = vpop.eup %2079  ;;  %v767_v7 = vadd.f32 1e-05, %v751_v3  ;;  %v874_v23 = vadd.f32 %v2608_v38, %v863_v12 }
 0x182   : > { %v805_v8 = vmul.f32 %v2078_v49, %v804_v5  ;;  %v811_v9 = vmul.f32 %v2080_v6, %v766_v50  ;;  %v695_v10 = vpop.xlane.xlu0 %694  ;;  %vm817_vm12 = vweird.f32 %v2080_v6 }
 0x183   : > { %2081 = vrsqrt.f32 %v767_v7  ;;  %v2623_v62 = vmul.f32 0.0078125, %v695_v10  ;;  %vm818_vm14 = vmor %vm816_vm13, %vm817_vm12  ;;  %v882_v39 = vmax.f32 %v874_v23, 0.0  ;;  %vm826_vm0 = vweird.f32 %v767_v7 }
 0x184   : > { %v812_v13 = vmul.f32 %v2080_v6, %v811_v9  ;;  %v719_v15 = vpop.xlane.xlu2 %718  ;;  %v809_v16 = vsel %vm808_vm11, %v2078_v49, %v805_v8 }
 0x185   : > { %v744_v18 = vmul.f32 %v2623_v62, %v2623_v62  ;;  %v736_v19 = vmul.f32 0.0078125, %v719_v15  ;;  %v853_v21 = vmul.f32 %v809_v16, %v757_v20 }
 0x186   : > { %v813_v22 = vmul.f32 0.5, %v812_v13 }
 0x187   : > { %v752_v24 = vsub.f32 %v736_v19, %v744_v18  ;;  %v864_v27 = vmul.f32 %v2599_v25, %v853_v21 }
 0x188   : > { %v814_v11 = vsub.f32 1.5, %v813_v22 }
 0x189   : > { %v2082_v28 = vpop.eup %2081  ;;  %v768_v30 = vadd.f32 1e-05, %v752_v24  ;;  %v875_v31 = vadd.f32 %v2608_v38, %v864_v27  ;;  %v2649_v24 = vld [vmem:[%s2997_s6] ss:$0 sm:$0xff] }
 0x18a   : > { %v815_v33 = vmul.f32 %v2080_v6, %v814_v11  ;;  %v821_v14 = vmul.f32 %v2082_v28, %v767_v7  ;;  %v697_v34 = vpop.xlane.xlu1 %696  ;;  %vm827_vm15 = vweird.f32 %v2082_v28 }
 0x18b   : > { %2083 = vrsqrt.f32 %v768_v30  ;;  %v729_v37 = vmul.f32 0.0078125, %v697_v34  ;;  %v883_v40 = vmax.f32 %v875_v31, 0.0  ;;  %vm828_vm1 = vmor %vm826_vm0, %vm827_vm15  ;;  %vm836_vm3 = vweird.f32 %v768_v30 }
 0x18c   : > { %v822_v41 = vmul.f32 %v2082_v28, %v821_v14  ;;  %v721_v42 = vpop.xlane.xlu0 %720  ;;  %v819_v43 = vsel %vm818_vm14, %v2080_v6, %v815_v33  ;;  %v760_v6 = vsub.f32 %v2577_v32, %v2623_v62 }
 0x18d   : > { %v745_v17 = vmul.f32 %v729_v37, %v729_v37  ;;  %v737_v45 = vmul.f32 0.0078125, %v721_v42  ;;  %v889_v46 = vpack.c.bf16 %v883_v40, %v882_v39  ;;  %v854_v49 = vmul.f32 %v819_v43, %v758_v44 }
 0x18e   : > { %v823_v47 = vmul.f32 0.5, %v822_v41  ;;  %v761_v12 = vsub.f32 %v2582_v35, %v729_v37 }
 0x18f   : > { %v753_v48 = vsub.f32 %v737_v45, %v745_v17  ;;  %956 = vmatmul.bf16.gmra.mxu1 %v889_v46  ;;  %v865_v26 = vmul.f32 %v2599_v25, %v854_v49 }
 0x190   : > { %v824_v50 = vsub.f32 1.5, %v823_v47 }
 0x191   : > { %v2084_v51 = vpop.eup %2083  ;;  %v769_v52 = vadd.f32 1e-05, %v753_v48  ;;  %v876_v61 = vadd.f32 %v2608_v38, %v865_v26 }
 0x192   : > { %v825_v53 = vmul.f32 %v2082_v28, %v824_v50  ;;  %v831_v54 = vmul.f32 %v2084_v51, %v768_v30  ;;  %vm837_vm2 = vweird.f32 %v2084_v51 }
 0x193   : > { %2085 = vrsqrt.f32 %v769_v52  ;;  %vm838_vm4 = vmor %vm836_vm3, %vm837_vm2  ;;  %v884_v55 = vmax.f32 %v876_v61, 0.0  ;;  %vm846_vm6 = vweird.f32 %v769_v52 }
 0x194   : > { %v832_v36 = vmul.f32 %v2084_v51, %v831_v54  ;;  %v829_v57 = vsel %vm828_vm1, %v2082_v28, %v825_v53 }
 0x195   : > { %v855_v58 = vmul.f32 %v829_v57, %v759_v56 }
 0x196   : > { %v833_v59 = vmul.f32 0.5, %v832_v36 }
 0x197   : > { %v866_v60 = vmul.f32 %v2599_v25, %v855_v58 }
 0x198   : > { %v834_v63 = vsub.f32 1.5, %v833_v59 }
 0x199   : > { %v2086_v0 = vpop.eup %2085  ;;  %v877_v1 = vadd.f32 %v2608_v38, %v866_v60 }
 0x19a   : > { %v835_v2 = vmul.f32 %v2084_v51, %v834_v63  ;;  %v841_v29 = vmul.f32 %v2086_v0, %v769_v52  ;;  %vm847_vm5 = vweird.f32 %v2086_v0 }
 0x19b   : > { %v885_v3 = vmax.f32 %v877_v1, 0.0  ;;  %vm848_vm7 = vmor %vm846_vm6, %vm847_vm5 }
 0x19c   : > { %v842_v4 = vmul.f32 %v2086_v0, %v841_v29  ;;  %v839_v5 = vsel %vm838_vm4, %v2084_v51, %v835_v2 }
 0x19d   : > { %v890_v7 = vpack.c.bf16 %v885_v3, %v884_v55  ;;  %v856_v9 = vmul.f32 %v839_v5, %v760_v6 }
 0x19e   : > { %v843_v8 = vmul.f32 0.5, %v842_v4 }
 0x19f   : > { %961 = vmatmul.bf16.gmra.mxu1 %v890_v7  ;;  %v867_v13 = vmul.f32 %v2599_v25, %v856_v9 }
 0x1a0   : > { %v844_v10 = vsub.f32 1.5, %v843_v8 }
 0x1a1   : > { %v878_v19 = vadd.f32 %v2608_v38, %v867_v13 }
 0x1a2   : > { %v845_v20 = vmul.f32 %v2086_v0, %v844_v10 }
 0x1a3   : > { %v886_v62 = vmax.f32 %v878_v19, 0.0 }
 0x1a4   : > { %v849_v15 = vsel %vm848_vm7, %v2086_v0, %v845_v20 }
 0x1a5   : > { %v857_v16 = vmul.f32 %v849_v15, %v761_v12 }
 0x1a7   : > { %v868_v18 = vmul.f32 %v2599_v25, %v857_v16 }
 0x1a9   : > { %v879_v32 = vadd.f32 %v2608_v38, %v868_v18 }
 0x1ab   : > { %v887_v21 = vmax.f32 %v879_v32, 0.0 }
 0x1ad   : > { %v891_v22 = vpack.c.bf16 %v887_v21, %v886_v62 }
 0x1af   : > { %966 = vmatmul.bf16.gmra.mxu1 %v891_v22 }
 0x1fc   : > { %v952_v35 = vpop.f32.mrf.mxu1 }
 0x1fd   : > { %v2652_v27 = vadd.f32 %v2649_v24, %v952_v35 }
 0x1ff   : > { %972 = vadd.xlane.f32.xlu1 %v2652_v27  ;;  %v988_v25 = vmul.f32 %v2652_v27, %v2652_v27 }
 0x201   : > { %996 = vadd.xlane.f32.xlu0 %v988_v25  ;;  %v2711_v25 = vld [vmem:[%s2998_s7] ss:$0 sm:$0xff] }
 0x204   : > { %v954_v38 = vpop.f32.mrf.mxu1 }
 0x205   : > { %v2658_v23 = vadd.f32 %v2649_v24, %v954_v38 }
 0x207   : > { %974 = vadd.xlane.f32.xlu2 %v2658_v23  ;;  %v989_v11 = vmul.f32 %v2658_v23, %v2658_v23 }
 0x209   : > { %998 = vadd.xlane.f32.xlu1 %v989_v11 }
 0x20c   : > { %v957_v28 = vpop.f32.mrf.mxu1 }
 0x20d   : > { %v2664_v30 = vadd.f32 %v2649_v24, %v957_v28 }
 0x20f   : > { %976 = vadd.xlane.f32.xlu2 %v2664_v30  ;;  %v990_v31 = vmul.f32 %v2664_v30, %v2664_v30 }
 0x211   : > { %1000 = vadd.xlane.f32.xlu1 %v990_v31 }
 0x214   : > { %v959_v33 = vpop.f32.mrf.mxu1 }
 0x215   : > { %v2670_v14 = vadd.f32 %v2649_v24, %v959_v33 }
 0x217   : > { %978 = vadd.xlane.f32.xlu0 %v2670_v14  ;;  %v991_v34 = vmul.f32 %v2670_v14, %v2670_v14 }
 0x219   : > { %1002 = vadd.xlane.f32.xlu2 %v991_v34 }
 0x21c   : > { %v962_v37 = vpop.f32.mrf.mxu1 }
 0x21d   : > { %v2676_v39 = vadd.f32 %v2649_v24, %v962_v37 }
 0x21f   : > { %980 = vadd.xlane.f32.xlu0 %v2676_v39  ;;  %v992_v40 = vmul.f32 %v2676_v39, %v2676_v39 }
 0x221   : > { %1004 = vadd.xlane.f32.xlu2 %v992_v40 }
 0x224   : > { %v964_v41 = vpop.f32.mrf.mxu1 }
 0x225   : > { %v2682_v42 = vadd.f32 %v2649_v24, %v964_v41  ;;  %v2720_v41 = vld [vmem:[%s2999_s8] ss:$0 sm:$0xff] }
 0x227   : > { %982 = vadd.xlane.f32.xlu1 %v2682_v42  ;;  %v993_v43 = vmul.f32 %v2682_v42, %v2682_v42 }
 0x229   : > { %1006 = vadd.xlane.f32.xlu0 %v993_v43 }
 0x22c   : > { %v967_v44 = vpop.f32.mrf.mxu1 }
 0x22d   : > { %v2688_v17 = vadd.f32 %v2649_v24, %v967_v44 }
 0x22f   : > { %984 = vadd.xlane.f32.xlu1 %v2688_v17  ;;  %v994_v45 = vmul.f32 %v2688_v17, %v2688_v17 }
 0x231   : > { %1008 = vadd.xlane.f32.xlu0 %v994_v45 }
 0x234   : > { %v969_v46 = vpop.f32.mrf.mxu1 }
 0x235   : > { %v2694_v47 = vadd.f32 %v2649_v24, %v969_v46 }
 0x237   : > { %986 = vadd.xlane.f32.xlu2 %v2694_v47  ;;  %v995_v48 = vmul.f32 %v2694_v47, %v2694_v47 }
 0x239   : > { %1010 = vadd.xlane.f32.xlu1 %v995_v48 }
 0x272   : > { %v973_v49 = vpop.xlane.xlu1 %972 }
 0x273   : > { %v1012_v50 = vmul.f32 0.0078125, %v973_v49 }
 0x274   : > { %v997_v51 = vpop.xlane.xlu0 %996 }
 0x275   : > { %v1028_v52 = vmul.f32 %v1012_v50, %v1012_v50  ;;  %v1020_v53 = vmul.f32 0.0078125, %v997_v51  ;;  %v1044_v19 = vsub.f32 %v2652_v27, %v1012_v50 }
 0x277   : > { %v1036_v54 = vsub.f32 %v1020_v53, %v1028_v52 }
 0x279   : > { %v1052_v56 = vadd.f32 1e-05, %v1036_v54 }
 0x27a   : > { %v975_v26 = vpop.xlane.xlu2 %974 }
 0x27b   : > { %2087 = vrsqrt.f32 %v1052_v56  ;;  %v1013_v36 = vmul.f32 0.0078125, %v975_v26  ;;  %vm1066_vm9 = vweird.f32 %v1052_v56 }
 0x27c   : > { %v999_v57 = vpop.xlane.xlu1 %998 }
 0x27d   : > { %v1029_v58 = vmul.f32 %v1013_v36, %v1013_v36  ;;  %v1021_v59 = vmul.f32 0.0078125, %v999_v57  ;;  %v1045_v34 = vsub.f32 %v2658_v23, %v1013_v36 }
 0x27f   : > { %v1037_v60 = vsub.f32 %v1021_v59, %v1029_v58 }
 0x281   : > { %v2088_v61 = vpop.eup %2087  ;;  %v1053_v63 = vadd.f32 1e-05, %v1037_v60 }
 0x282   : > { %v1061_v0 = vmul.f32 %v2088_v61, %v1052_v56  ;;  %v977_v1 = vpop.xlane.xlu2 %976  ;;  %vm1067_vm8 = vweird.f32 %v2088_v61 }
 0x283   : > { %2089 = vrsqrt.f32 %v1053_v63  ;;  %v2699_v2 = vmul.f32 0.0078125, %v977_v1  ;;  %vm1068_vm10 = vmor %vm1066_vm9, %vm1067_vm8  ;;  %vm1076_vm12 = vweird.f32 %v1053_v63 }
 0x284   : > { %v1062_v29 = vmul.f32 %v2088_v61, %v1061_v0  ;;  %v1001_v55 = vpop.xlane.xlu1 %1000 }
 0x285   : > { %v1030_v3 = vmul.f32 %v2699_v2, %v2699_v2  ;;  %v1022_v4 = vmul.f32 0.0078125, %v1001_v55 }
 0x286   : > { %v1063_v5 = vmul.f32 0.5, %v1062_v29  ;;  %v1046_v29 = vsub.f32 %v2664_v30, %v2699_v2 }
 0x287   : > { %v1038_v6 = vsub.f32 %v1022_v4, %v1030_v3 }
 0x288   : > { %v1064_v7 = vsub.f32 1.5, %v1063_v5 }
 0x289   : > { %v2090_v8 = vpop.eup %2089  ;;  %v1054_v9 = vadd.f32 1e-05, %v1038_v6 }
 0x28a   : > { %v1065_v10 = vmul.f32 %v2088_v61, %v1064_v7  ;;  %v1071_v20 = vmul.f32 %v2090_v8, %v1053_v63  ;;  %v979_v12 = vpop.xlane.xlu0 %978  ;;  %vm1077_vm11 = vweird.f32 %v2090_v8 }
 0x28b   : > { %2091 = vrsqrt.f32 %v1054_v9  ;;  %v2703_v13 = vmul.f32 0.0078125, %v979_v12  ;;  %vm1078_vm13 = vmor %vm1076_vm12, %vm1077_vm11  ;;  %vm1086_vm15 = vweird.f32 %v1054_v9 }
 0x28c   : > { %v1072_v15 = vmul.f32 %v2090_v8, %v1071_v20  ;;  %v1003_v16 = vpop.xlane.xlu2 %1002  ;;  %v1069_v18 = vsel %vm1068_vm10, %v2088_v61, %v1065_v10 }
 0x28d   : > { %v1031_v32 = vmul.f32 %v2703_v13, %v2703_v13  ;;  %v1023_v62 = vmul.f32 0.0078125, %v1003_v16  ;;  %v1140_v35 = vmul.f32 %v1069_v18, %v1044_v19  ;;  %v1047_v30 = vsub.f32 %v2670_v14, %v2703_v13 }
 0x28e   : > { %v1073_v21 = vmul.f32 0.5, %v1072_v15 }
 0x28f   : > { %v1039_v22 = vsub.f32 %v1023_v62, %v1031_v32  ;;  %v1151_v40 = vmul.f32 %v2711_v25, %v1140_v35 }
 0x290   : > { %v1074_v38 = vsub.f32 1.5, %v1073_v21 }
 0x291   : > { %v2092_v11 = vpop.eup %2091  ;;  %v1055_v28 = vadd.f32 1e-05, %v1039_v22  ;;  %v1162_v52 = vadd.f32 %v2720_v41, %v1151_v40 }
 0x292   : > { %v1075_v31 = vmul.f32 %v2090_v8, %v1074_v38  ;;  %v1081_v33 = vmul.f32 %v2092_v11, %v1054_v9  ;;  %v981_v27 = vpop.xlane.xlu0 %980  ;;  %vm1087_vm14 = vweird.f32 %v2092_v11 }
 0x293   : > { %2093 = vrsqrt.f32 %v1055_v28  ;;  %v2714_v37 = vmul.f32 0.0078125, %v981_v27  ;;  %vm1088_vm0 = vmor %vm1086_vm15, %vm1087_vm14  ;;  %v1170_v60 = vmax.f32 %v1162_v52, 0.0  ;;  %vm1096_vm2 = vweird.f32 %v1055_v28 }
 0x294   : > { %v1082_v43 = vmul.f32 %v2092_v11, %v1081_v33  ;;  %v1005_v44 = vpop.xlane.xlu2 %1004  ;;  %v1079_v45 = vsel %vm1078_vm13, %v2090_v8, %v1075_v31 }
 0x295   : > { %v1032_v46 = vmul.f32 %v2714_v37, %v2714_v37  ;;  %v1024_v48 = vmul.f32 0.0078125, %v1005_v44  ;;  %v1141_v49 = vmul.f32 %v1079_v45, %v1045_v34 }
 0x296   : > { %v1083_v23 = vmul.f32 0.5, %v1082_v43 }
 0x297   : > { %v1040_v50 = vsub.f32 %v1024_v48, %v1032_v46  ;;  %v1152_v51 = vmul.f32 %v2711_v25, %v1141_v49 }
 0x298   : > { %v1084_v53 = vsub.f32 1.5, %v1083_v23  ;;  %v1048_v23 = vsub.f32 %v2676_v39, %v2714_v37 }
 0x299   : > { %v2094_v54 = vpop.eup %2093  ;;  %v1056_v56 = vadd.f32 1e-05, %v1040_v50  ;;  %v1163_v26 = vadd.f32 %v2720_v41, %v1152_v51 }
 0x29a   : > { %v1085_v36 = vmul.f32 %v2092_v11, %v1084_v53  ;;  %v1091_v57 = vmul.f32 %v2094_v54, %v1055_v28  ;;  %v983_v58 = vpop.xlane.xlu1 %982  ;;  %vm1097_vm1 = vweird.f32 %v2094_v54 }
 0x29b   : > { %2095 = vrsqrt.f32 %v1056_v56  ;;  %v2727_v59 = vmul.f32 0.0078125, %v983_v58  ;;  %v1171_v61 = vmax.f32 %v1163_v26, 0.0  ;;  %vm1098_vm3 = vmor %vm1096_vm2, %vm1097_vm1  ;;  %vm1106_vm5 = vweird.f32 %v1056_v56 }
 0x29c   : > { %v1092_v63 = vmul.f32 %v2094_v54, %v1091_v57  ;;  %v1007_v0 = vpop.xlane.xlu0 %1006  ;;  %v1089_v1 = vsel %vm1088_vm0, %v2092_v11, %v1085_v36 }
 0x29d   : > { %v1033_v55 = vmul.f32 %v2727_v59, %v2727_v59  ;;  %v1025_v3 = vmul.f32 0.0078125, %v1007_v0  ;;  %v1178_v4 = vpack.c.bf16 %v1171_v61, %v1170_v60  ;;  %v1142_v7 = vmul.f32 %v1089_v1, %v1046_v29 }
 0x29e   : > { %v1093_v5 = vmul.f32 0.5, %v1092_v63  ;;  %v1049_v61 = vsub.f32 %v2682_v42, %v2727_v59 }
 0x29f   : > { %v1041_v6 = vsub.f32 %v1025_v3, %v1033_v55  ;;  %1190 = vmatmul.bf16.vlgmr.msra.gmra.mxu2 %v1178_v4  ;;  %v1153_v16 = vmul.f32 %v2711_v25, %v1142_v7 }
 0x2a0   : > { %v1094_v8 = vsub.f32 1.5, %v1093_v5 }
 0x2a1   : > { %v2096_v9 = vpop.eup %2095  ;;  %v1057_v10 = vadd.f32 1e-05, %v1041_v6  ;;  %v1164_v14 = vadd.f32 %v2720_v41, %v1153_v16 }
 0x2a2   : > { %v1095_v20 = vmul.f32 %v2094_v54, %v1094_v8  ;;  %v1101_v12 = vmul.f32 %v2096_v9, %v1056_v56  ;;  %v985_v15 = vpop.xlane.xlu1 %984  ;;  %vm1107_vm4 = vweird.f32 %v2096_v9 }
 0x2a3   : > { %2097 = vrsqrt.f32 %v1057_v10  ;;  %v2735_v2 = vmul.f32 0.0078125, %v985_v15  ;;  %vm1108_vm6 = vmor %vm1106_vm5, %vm1107_vm4  ;;  %v1172_v44 = vmax.f32 %v1164_v14, 0.0  ;;  %vm1116_vm8 = vweird.f32 %v1057_v10 }
 0x2a4   : > { %v1102_v18 = vmul.f32 %v2096_v9, %v1101_v12  ;;  %v1009_v19 = vpop.xlane.xlu0 %1008  ;;  %v1099_v32 = vsel %vm1098_vm3, %v2094_v54, %v1095_v20 }
 0x2a5   : > { %v1034_v62 = vmul.f32 %v2735_v2, %v2735_v2  ;;  %v1026_v21 = vmul.f32 0.0078125, %v1009_v19  ;;  %v1143_v22 = vmul.f32 %v1099_v32, %v1047_v30 }
 0x2a6   : > { %v1103_v35 = vmul.f32 0.5, %v1102_v18 }
 0x2a7   : > { %v1042_v38 = vsub.f32 %v1026_v21, %v1034_v62  ;;  %v1154_v11 = vmul.f32 %v2711_v25, %v1143_v22 }
 0x2a8   : > { %v1104_v13 = vsub.f32 1.5, %v1103_v35 }
 0x2a9   : > { %v2098_v28 = vpop.eup %2097  ;;  %v1058_v31 = vadd.f32 1e-05, %v1042_v38  ;;  %v1165_v33 = vadd.f32 %v2720_v41, %v1154_v11 }
 0x2aa   : > { %v1105_v27 = vmul.f32 %v2096_v9, %v1104_v13  ;;  %v1111_v34 = vmul.f32 %v2098_v28, %v1057_v10  ;;  %v987_v40 = vpop.xlane.xlu2 %986  ;;  %vm1117_vm7 = vweird.f32 %v2098_v28  ;;  %v1050_v10 = vsub.f32 %v2688_v17, %v2735_v2 }
 0x2ab   : > { %2099 = vrsqrt.f32 %v1058_v31  ;;  %v1019_v43 = vmul.f32 0.0078125, %v987_v40  ;;  %v1173_v45 = vmax.f32 %v1165_v33, 0.0  ;;  %vm1118_vm9 = vmor %vm1116_vm8, %vm1117_vm7  ;;  %vm1126_vm11 = vweird.f32 %v1058_v31 }
 0x2ac   : > { %v1112_v46 = vmul.f32 %v2098_v28, %v1111_v34  ;;  %v1011_v48 = vpop.xlane.xlu1 %1010  ;;  %v1109_v49 = vsel %vm1108_vm6, %v2096_v9, %v1105_v27 }
 0x2ad   : > { %v1035_v50 = vmul.f32 %v1019_v43, %v1019_v43  ;;  %v1027_v51 = vmul.f32 0.0078125, %v1011_v48  ;;  %v1179_v52 = vpack.c.bf16 %v1173_v45, %v1172_v44  ;;  %v1144_v56 = vmul.f32 %v1109_v49, %v1048_v23 }
 0x2ae   : > { %v1113_v53 = vmul.f32 0.5, %v1112_v46  ;;  %v1051_v18 = vsub.f32 %v2694_v47, %v1019_v43 }
 0x2af   : > { %v1043_v54 = vsub.f32 %v1027_v51, %v1035_v50  ;;  %1195 = vmatmul.bf16.gmra.mxu2 %v1179_v52  ;;  %v1155_v39 = vmul.f32 %v2711_v25, %v1144_v56 }
 0x2b0   : > { %v1114_v26 = vsub.f32 1.5, %v1113_v53 }
 0x2b1   : > { %v2100_v36 = vpop.eup %2099  ;;  %v1059_v57 = vadd.f32 1e-05, %v1043_v54  ;;  %v1166_v55 = vadd.f32 %v2720_v41, %v1155_v39 }
 0x2b2   : > { %v1115_v58 = vmul.f32 %v2098_v28, %v1114_v26  ;;  %v1121_v60 = vmul.f32 %v2100_v36, %v1058_v31  ;;  %vm1127_vm10 = vweird.f32 %v2100_v36 }
 0x2b3   : > { %2101 = vrsqrt.f32 %v1059_v57  ;;  %vm1128_vm12 = vmor %vm1126_vm11, %vm1127_vm10  ;;  %v1174_v59 = vmax.f32 %v1166_v55, 0.0  ;;  %vm1136_vm14 = vweird.f32 %v1059_v57  ;;  %v1969_v55 = vld [vmem:[#allocation8 + $0x8] sm:$0xff] }
 0x2b4   : > { %v1122_v37 = vmul.f32 %v2100_v36, %v1121_v60  ;;  %v1119_v63 = vsel %vm1118_vm9, %v2098_v28, %v1115_v58  ;;  %v1973_v58 = vld [vmem:[#allocation8 + $0x28] sm:$0xff]  ;;  %v1972_v60 = vld [vmem:[#allocation8 + $0x20] sm:$0xff] }
 0x2b5   : > { %v1145_v0 = vmul.f32 %v1119_v63, %v1049_v61  ;;  %v1971_v61 = vld [vmem:[#allocation8 + $0x18] sm:$0xff] }
 0x2b6   : > { %v1123_v1 = vmul.f32 0.5, %v1122_v37 }
 0x2b7   : > { %v1156_v29 = vmul.f32 %v2711_v25, %v1145_v0 }
 0x2b8   : > { %v1124_v3 = vsub.f32 1.5, %v1123_v1 }
 0x2b9   : > { %v2102_v4 = vpop.eup %2101  ;;  %v1167_v5 = vadd.f32 %v2720_v41, %v1156_v29 }
 0x2ba   : > { %v1125_v6 = vmul.f32 %v2100_v36, %v1124_v3  ;;  %v1131_v42 = vmul.f32 %v2102_v4, %v1059_v57  ;;  %vm1137_vm13 = vweird.f32 %v2102_v4  ;;  %v1974_v57 = vld [vmem:[#allocation8 + $0x30] sm:$0xff] }
 0x2bb   : > { %v1175_v7 = vmax.f32 %v1167_v5, 0.0  ;;  %vm1138_vm15 = vmor %vm1136_vm14, %vm1137_vm13 }
 0x2bc   : > { %v1132_v8 = vmul.f32 %v2102_v4, %v1131_v42  ;;  %v1129_v9 = vsel %vm1128_vm12, %v2100_v36, %v1125_v6  ;;  %v1975_v36 = vld [vmem:[#allocation8 + $0x38] sm:$0xff]  ;;  %v1968_v6 = vld [vmem:[#allocation8] sm:$0xff] }
 0x2bd   : > { %v1180_v20 = vpack.c.bf16 %v1175_v7, %v1174_v59  ;;  %v1146_v15 = vmul.f32 %v1129_v9, %v1050_v10  ;;  %1466 = vmatpush.bf16.msra.mxu3 %v1975_v36 }
 0x2be   : > { %v1133_v12 = vmul.f32 0.5, %v1132_v8 }
 0x2bf   : > { %1200 = vmatmul.bf16.gmra.mxu2 %v1180_v20  ;;  %v1157_v19 = vmul.f32 %v2711_v25, %v1146_v15 }
 0x2c0   : > { %v1134_v30 = vsub.f32 1.5, %v1133_v12 }
 0x2c1   : > { %v1168_v22 = vadd.f32 %v2720_v41, %v1157_v19  ;;  %1467 = vmatpush.bf16.msra.mxu3 %v1974_v57 }
 0x2c2   : > { %v1135_v16 = vmul.f32 %v2102_v4, %v1134_v30 }
 0x2c3   : > { %v1176_v2 = vmax.f32 %v1168_v22, 0.0 }
 0x2c4   : > { %v1139_v32 = vsel %vm1138_vm15, %v2102_v4, %v1135_v16 }
 0x2c5   : > { %v1147_v62 = vmul.f32 %v1139_v32, %v1051_v18  ;;  %1468 = vmatpush.bf16.msra.mxu3 %v1973_v58 }
 0x2c7   : > { %v1158_v21 = vmul.f32 %v2711_v25, %v1147_v62 }
 0x2c9   : > { %v1169_v17 = vadd.f32 %v2720_v41, %v1158_v21  ;;  %1469 = vmatpush.bf16.msra.mxu3 %v1972_v60 }
 0x2cb   : > { %v1177_v35 = vmax.f32 %v1169_v17, 0.0 }
 0x2cd   : > { %v1181_v38 = vpack.c.bf16 %v1177_v35, %v1176_v2  ;;  %1470 = vmatpush.bf16.msra.mxu3 %v1971_v61 }
 0x2cf   : > { %1205 = vmatmul.bf16.gmra.mxu2 %v1181_v38 }
 0x322   : > { %v1191_v11 = vpop.f32.mrf.mxu2 }
 0x323   : > { %v2759_v14 = vadd.f32 %v2649_v24, %v1191_v11 }
 0x325   : > { %1211 = vadd.xlane.f32.xlu2 %v2759_v14  ;;  %v1227_v47 = vmul.f32 %v2759_v14, %v2759_v14 }
 0x327   : > { %1235 = vadd.xlane.f32.xlu1 %v1227_v47 }
 0x32a   : > { %v1193_v13 = vpop.f32.mrf.mxu2 }
 0x32b   : > { %v2765_v28 = vadd.f32 %v2649_v24, %v1193_v13 }
 0x32d   : > { %1213 = vadd.xlane.f32.xlu0 %v2765_v28  ;;  %v1228_v31 = vmul.f32 %v2765_v28, %v2765_v28 }
 0x32f   : > { %1237 = vadd.xlane.f32.xlu2 %v1228_v31 }
 0x332   : > { %v1196_v33 = vpop.f32.mrf.mxu2 }
 0x333   : > { %v2771_v27 = vadd.f32 %v2649_v24, %v1196_v33 }
 0x335   : > { %1215 = vadd.xlane.f32.xlu0 %v2771_v27  ;;  %v1229_v34 = vmul.f32 %v2771_v27, %v2771_v27 }
 0x337   : > { %1239 = vadd.xlane.f32.xlu2 %v1229_v34 }
 0x33a   : > { %v1198_v40 = vpop.f32.mrf.mxu2 }
 0x33b   : > { %v2777_v43 = vadd.f32 %v2649_v24, %v1198_v40 }
 0x33d   : > { %1217 = vadd.xlane.f32.xlu1 %v2777_v43  ;;  %v1230_v44 = vmul.f32 %v2777_v43, %v2777_v43 }
 0x33f   : > { %1241 = vadd.xlane.f32.xlu0 %v1230_v44 }
 0x342   : > { %v1201_v45 = vpop.f32.mrf.mxu2 }
 0x343   : > { %v2783_v46 = vadd.f32 %v2649_v24, %v1201_v45 }
 0x345   : > { %1219 = vadd.xlane.f32.xlu1 %v2783_v46  ;;  %v1231_v48 = vmul.f32 %v2783_v46, %v2783_v46 }
 0x347   : > { %1243 = vadd.xlane.f32.xlu0 %v1231_v48 }
 0x34a   : > { %v1203_v49 = vpop.f32.mrf.mxu2 }
 0x34b   : > { %v2789_v23 = vadd.f32 %v2649_v24, %v1203_v49 }
 0x34d   : > { %1221 = vadd.xlane.f32.xlu2 %v2789_v23  ;;  %v1232_v50 = vmul.f32 %v2789_v23, %v2789_v23 }
 0x34f   : > { %1245 = vadd.xlane.f32.xlu1 %v1232_v50 }
 0x352   : > { %v1206_v51 = vpop.f32.mrf.mxu2 }
 0x353   : > { %v2795_v52 = vadd.f32 %v2649_v24, %v1206_v51 }
 0x355   : > { %1223 = vadd.xlane.f32.xlu2 %v2795_v52  ;;  %v1233_v53 = vmul.f32 %v2795_v52, %v2795_v52 }
 0x357   : > { %1247 = vadd.xlane.f32.xlu1 %v1233_v53 }
 0x35a   : > { %v1208_v54 = vpop.f32.mrf.mxu2 }
 0x35b   : > { %v2801_v56 = vadd.f32 %v2649_v24, %v1208_v54  ;;  %v1970_v24 = vld [vmem:[#allocation8 + $0x10] sm:$0xff] }
 0x35c   : > { %1471 = vmatpush.bf16.msra.mxu3 %v1970_v24 }
 0x35d   : > { %1225 = vadd.xlane.f32.xlu0 %v2801_v56  ;;  %v1234_v26 = vmul.f32 %v2801_v56, %v2801_v56 }
 0x35f   : > { %1249 = vadd.xlane.f32.xlu2 %v1234_v26 }
 0x360   : > { %1472 = vmatpush.bf16.msra.mxu3 %v1969_v55 }
 0x364   : > { %1473 = vmatpush.bf16.msra.mxu3 %v1968_v6 }
 0x398   : > { %v1212_v39 = vpop.xlane.xlu2 %1211 }
 0x399   : > { %v1251_v37 = vmul.f32 0.0078125, %v1212_v39 }
 0x39a   : > { %v1236_v63 = vpop.xlane.xlu1 %1235 }
 0x39b   : > { %v1267_v0 = vmul.f32 %v1251_v37, %v1251_v37  ;;  %v1259_v1 = vmul.f32 0.0078125, %v1236_v63  ;;  %v1283_v33 = vsub.f32 %v2759_v14, %v1251_v37 }
 0x39d   : > { %v1275_v29 = vsub.f32 %v1259_v1, %v1267_v0 }
 0x39f   : > { %v1291_v3 = vadd.f32 1e-05, %v1275_v29 }
 0x3a0   : > { %v1214_v4 = vpop.xlane.xlu0 %1213 }
 0x3a1   : > { %2103 = vrsqrt.f32 %v1291_v3  ;;  %v1252_v5 = vmul.f32 0.0078125, %v1214_v4  ;;  %vm1305_vm1 = vweird.f32 %v1291_v3 }
 0x3a2   : > { %v1238_v42 = vpop.xlane.xlu2 %1237 }
 0x3a3   : > { %v1268_v59 = vmul.f32 %v1252_v5, %v1252_v5  ;;  %v1260_v7 = vmul.f32 0.0078125, %v1238_v42  ;;  %v1284_v36 = vsub.f32 %v2765_v28, %v1252_v5 }
 0x3a5   : > { %v1276_v8 = vsub.f32 %v1260_v7, %v1268_v59 }
 0x3a7   : > { %v2104_v9 = vpop.eup %2103  ;;  %v1292_v10 = vadd.f32 1e-05, %v1276_v8 }
 0x3a8   : > { %v1300_v20 = vmul.f32 %v2104_v9, %v1291_v3  ;;  %v1216_v12 = vpop.xlane.xlu0 %1215  ;;  %vm1306_vm0 = vweird.f32 %v2104_v9 }
 0x3a9   : > { %2105 = vrsqrt.f32 %v1292_v10  ;;  %v2806_v15 = vmul.f32 0.0078125, %v1216_v12  ;;  %vm1307_vm2 = vmor %vm1305_vm1, %vm1306_vm0  ;;  %vm1315_vm4 = vweird.f32 %v1292_v10 }
 0x3aa   : > { %v1301_v30 = vmul.f32 %v2104_v9, %v1300_v20  ;;  %v1240_v16 = vpop.xlane.xlu2 %1239 }
 0x3ab   : > { %v1269_v18 = vmul.f32 %v2806_v15, %v2806_v15  ;;  %v1261_v19 = vmul.f32 0.0078125, %v1240_v16  ;;  %v1285_v12 = vsub.f32 %v2771_v27, %v2806_v15 }
 0x3ac   : > { %v1302_v32 = vmul.f32 0.5, %v1301_v30 }
 0x3ad   : > { %v1277_v62 = vsub.f32 %v1261_v19, %v1269_v18 }
 0x3ae   : > { %v1303_v21 = vsub.f32 1.5, %v1302_v32 }
 0x3af   : > { %v2106_v22 = vpop.eup %2105  ;;  %v1293_v17 = vadd.f32 1e-05, %v1277_v62 }
 0x3b0   : > { %v1304_v2 = vmul.f32 %v2104_v9, %v1303_v21  ;;  %v1310_v35 = vmul.f32 %v2106_v22, %v1292_v10  ;;  %v1218_v38 = vpop.xlane.xlu1 %1217  ;;  %vm1316_vm3 = vweird.f32 %v2106_v22 }
 0x3b1   : > { %2107 = vrsqrt.f32 %v1293_v17  ;;  %v2810_v11 = vmul.f32 0.0078125, %v1218_v38  ;;  %vm1317_vm5 = vmor %vm1315_vm4, %vm1316_vm3  ;;  %vm1325_vm7 = vweird.f32 %v1293_v17 }
 0x3b2   : > { %v1311_v47 = vmul.f32 %v2106_v22, %v1310_v35  ;;  %v1242_v13 = vpop.xlane.xlu0 %1241  ;;  %v1308_v31 = vsel %vm1307_vm2, %v2104_v9, %v1304_v2 }
 0x3b3   : > { %v1270_v34 = vmul.f32 %v2810_v11, %v2810_v11  ;;  %v1262_v40 = vmul.f32 0.0078125, %v1242_v13  ;;  %v1379_v48 = vmul.f32 %v1308_v31, %v1283_v33  ;;  %v1286_v27 = vsub.f32 %v2777_v43, %v2810_v11 }
 0x3b4   : > { %v1312_v44 = vmul.f32 0.5, %v1311_v47 }
 0x3b5   : > { %v1278_v45 = vsub.f32 %v1262_v40, %v1270_v34  ;;  %v1387_v57 = vmul.f32 %v2711_v25, %v1379_v48 }
 0x3b6   : > { %v1313_v49 = vsub.f32 1.5, %v1312_v44 }
 0x3b7   : > { %v2108_v50 = vpop.eup %2107  ;;  %v1294_v51 = vadd.f32 1e-05, %v1278_v45  ;;  %v1395_v28 = vadd.f32 %v2720_v41, %v1387_v57 }
 0x3b8   : > { %v1314_v53 = vmul.f32 %v2106_v22, %v1313_v49  ;;  %v1320_v54 = vmul.f32 %v2108_v50, %v1293_v17  ;;  %v1220_v26 = vpop.xlane.xlu1 %1219  ;;  %vm1326_vm6 = vweird.f32 %v2108_v50 }
 0x3b9   : > { %2109 = vrsqrt.f32 %v1294_v51  ;;  %v2816_v14 = vmul.f32 0.0078125, %v1220_v26  ;;  %vm1327_vm8 = vmor %vm1325_vm7, %vm1326_vm6  ;;  %v1403_v7 = vmax.f32 %v1395_v28, 0.0  ;;  %vm1335_vm10 = vweird.f32 %v1294_v51 }
 0x3ba   : > { %v1321_v58 = vmul.f32 %v2108_v50, %v1320_v54  ;;  %v1244_v60 = vpop.xlane.xlu0 %1243  ;;  %v1318_v61 = vsel %vm1317_vm5, %v2106_v22, %v1314_v53 }
 0x3bb   : > { %v1271_v39 = vmul.f32 %v2816_v14, %v2816_v14  ;;  %v1263_v37 = vmul.f32 0.0078125, %v1244_v60  ;;  %v1380_v24 = vmul.f32 %v1318_v61, %v1284_v36 }
 0x3bc   : > { %v1322_v63 = vmul.f32 0.5, %v1321_v58 }
 0x3bd   : > { %v1279_v0 = vsub.f32 %v1263_v37, %v1271_v39  ;;  %v1388_v1 = vmul.f32 %v2711_v25, %v1380_v24  ;;  %v1287_v24 = vsub.f32 %v2783_v46, %v2816_v14 }
 0x3be   : > { %v1323_v29 = vsub.f32 1.5, %v1322_v63 }
 0x3bf   : > { %v2110_v55 = vpop.eup %2109  ;;  %v1295_v3 = vadd.f32 1e-05, %v1279_v0  ;;  %v1396_v4 = vadd.f32 %v2720_v41, %v1388_v1 }
 0x3c0   : > { %v1324_v5 = vmul.f32 %v2108_v50, %v1323_v29  ;;  %v1330_v6 = vmul.f32 %v2110_v55, %v1294_v51  ;;  %v1222_v42 = vpop.xlane.xlu2 %1221  ;;  %vm1336_vm9 = vweird.f32 %v2110_v55 }
 0x3c1   : > { %2111 = vrsqrt.f32 %v1295_v3  ;;  %v2824_v59 = vmul.f32 0.0078125, %v1222_v42  ;;  %v1404_v8 = vmax.f32 %v1396_v4, 0.0  ;;  %vm1337_vm11 = vmor %vm1335_vm10, %vm1336_vm9  ;;  %vm1345_vm13 = vweird.f32 %v1295_v3 }
 0x3c2   : > { %v1331_v9 = vmul.f32 %v2110_v55, %v1330_v6  ;;  %v1246_v10 = vpop.xlane.xlu1 %1245  ;;  %v1328_v20 = vsel %vm1327_vm8, %v2108_v50, %v1324_v5 }
 0x3c3   : > { %v1272_v30 = vmul.f32 %v2824_v59, %v2824_v59  ;;  %v1264_v16 = vmul.f32 0.0078125, %v1246_v10  ;;  %v1411_v18 = vpack.c.bf16 %v1404_v8, %v1403_v7  ;;  %v1381_v62 = vmul.f32 %v1328_v20, %v1285_v12 }
 0x3c4   : > { %v1332_v19 = vmul.f32 0.5, %v1331_v9  ;;  %v1288_v7 = vsub.f32 %v2789_v23, %v2824_v59 }
 0x3c5   : > { %v1280_v32 = vsub.f32 %v1264_v16, %v1272_v30  ;;  %1474 = vmatmul.bf16.vlgmr.msra.gmra.mxu3 %v1411_v18  ;;  %v1389_v47 = vmul.f32 %v2711_v25, %v1381_v62 }
 0x3c6   : > { %v1333_v21 = vsub.f32 1.5, %v1332_v19 }
 0x3c7   : > { %v2112_v22 = vpop.eup %2111  ;;  %v1296_v17 = vadd.f32 1e-05, %v1280_v32  ;;  %v1397_v43 = vadd.f32 %v2720_v41, %v1389_v47 }
 0x3c8   : > { %v1334_v2 = vmul.f32 %v2110_v55, %v1333_v21  ;;  %v1340_v35 = vmul.f32 %v2112_v22, %v1295_v3  ;;  %v1224_v38 = vpop.xlane.xlu2 %1223  ;;  %vm1346_vm12 = vweird.f32 %v2112_v22 }
 0x3c9   : > { %2113 = vrsqrt.f32 %v1296_v17  ;;  %v2832_v15 = vmul.f32 0.0078125, %v1224_v38  ;;  %vm1347_vm14 = vmor %vm1345_vm13, %vm1346_vm12  ;;  %v1405_v58 = vmax.f32 %v1397_v43, 0.0  ;;  %vm1355_vm0 = vweird.f32 %v1296_v17 }
 0x3ca   : > { %v1341_v13 = vmul.f32 %v2112_v22, %v1340_v35  ;;  %v1248_v31 = vpop.xlane.xlu1 %1247  ;;  %v1338_v33 = vsel %vm1337_vm11, %v2110_v55, %v1334_v2 }
 0x3cb   : > { %v1273_v34 = vmul.f32 %v2832_v15, %v2832_v15  ;;  %v1265_v40 = vmul.f32 0.0078125, %v1248_v31  ;;  %v1382_v44 = vmul.f32 %v1338_v33, %v1286_v27 }
 0x3cc   : > { %v1342_v45 = vmul.f32 0.5, %v1341_v13 }
 0x3cd   : > { %v1281_v48 = vsub.f32 %v1265_v40, %v1273_v34  ;;  %v1390_v49 = vmul.f32 %v2711_v25, %v1382_v44 }
 0x3ce   : > { %v1343_v11 = vsub.f32 1.5, %v1342_v45 }
 0x3cf   : > { %v2114_v50 = vpop.eup %2113  ;;  %v1297_v51 = vadd.f32 1e-05, %v1281_v48  ;;  %v1398_v53 = vadd.f32 %v2720_v41, %v1390_v49  ;;  %v2068_v48 = vld [vmem:[%s3001_s10] ss:$0 sm:$0xff] }
 0x3d0   : > { %v1344_v54 = vmul.f32 %v2112_v22, %v1343_v11  ;;  %v1350_v26 = vmul.f32 %v2114_v50, %v1296_v17  ;;  %v1226_v36 = vpop.xlane.xlu0 %1225  ;;  %vm1356_vm15 = vweird.f32 %v2114_v50 }
 0x3d1   : > { %2115 = vrsqrt.f32 %v1297_v51  ;;  %v1258_v57 = vmul.f32 0.0078125, %v1226_v36  ;;  %v1406_v60 = vmax.f32 %v1398_v53, 0.0  ;;  %vm1357_vm1 = vmor %vm1355_vm0, %vm1356_vm15  ;;  %vm1365_vm3 = vweird.f32 %v1297_v51 }
 0x3d2   : > { %v1351_v61 = vmul.f32 %v2114_v50, %v1350_v26  ;;  %v1250_v39 = vpop.xlane.xlu2 %1249  ;;  %v1348_v37 = vsel %vm1347_vm14, %v2112_v22, %v1344_v54  ;;  %v1289_v22 = vsub.f32 %v2795_v52, %v2832_v15 }
 0x3d3   : > { %v1274_v63 = vmul.f32 %v1258_v57, %v1258_v57  ;;  %v1266_v0 = vmul.f32 0.0078125, %v1250_v39  ;;  %v1412_v1 = vpack.c.bf16 %v1406_v60, %v1405_v58  ;;  %v1383_v55 = vmul.f32 %v1348_v37, %v1287_v24 }
 0x3d4   : > { %v1352_v28 = vmul.f32 0.5, %v1351_v61  ;;  %v1290_v47 = vsub.f32 %v2801_v56, %v1258_v57 }
 0x3d5   : > { %v1282_v29 = vsub.f32 %v1266_v0, %v1274_v63  ;;  %1479 = vmatmul.bf16.gmra.mxu3 %v1412_v1  ;;  %v1391_v46 = vmul.f32 %v2711_v25, %v1383_v55 }
 0x3d6   : > { %v1353_v3 = vsub.f32 1.5, %v1352_v28 }
 0x3d7   : > { %v2116_v4 = vpop.eup %2115  ;;  %v1298_v5 = vadd.f32 1e-05, %v1282_v29  ;;  %v1399_v12 = vadd.f32 %v2720_v41, %v1391_v46 }
 0x3d8   : > { %v1354_v6 = vmul.f32 %v2114_v50, %v1353_v3  ;;  %v1360_v42 = vmul.f32 %v2116_v4, %v1297_v51  ;;  %vm1366_vm2 = vweird.f32 %v2116_v4 }
 0x3d9   : > { %2117 = vrsqrt.f32 %v1298_v5  ;;  %vm1367_vm4 = vmor %vm1365_vm3, %vm1366_vm2  ;;  %v1407_v59 = vmax.f32 %v1399_v12, 0.0  ;;  %vm1375_vm6 = vweird.f32 %v1298_v5 }
 0x3da   : > { %v1361_v14 = vmul.f32 %v2116_v4, %v1360_v42  ;;  %v1358_v8 = vsel %vm1357_vm1, %v2114_v50, %v1354_v6 }
 0x3db   : > { %v1384_v9 = vmul.f32 %v1358_v8, %v1288_v7 }
 0x3dc   : > { %v1362_v10 = vmul.f32 0.5, %v1361_v14 }
 0x3dd   : > { %v1392_v20 = vmul.f32 %v2711_v25, %v1384_v9 }
 0x3de   : > { %v1363_v30 = vsub.f32 1.5, %v1362_v10 }
 0x3df   : > { %v2118_v16 = vpop.eup %2117  ;;  %v1400_v18 = vadd.f32 %v2720_v41, %v1392_v20 }
 0x3e0   : > { %v1364_v19 = vmul.f32 %v2116_v4, %v1363_v30  ;;  %v1370_v23 = vmul.f32 %v2118_v16, %v1298_v5  ;;  %vm1376_vm5 = vweird.f32 %v2118_v16 }
 0x3e1   : > { %v1408_v32 = vmax.f32 %v1400_v18, 0.0  ;;  %vm1377_vm7 = vmor %vm1375_vm6, %vm1376_vm5 }
 0x3e2   : > { %v1371_v62 = vmul.f32 %v2118_v16, %v1370_v23  ;;  %v1368_v21 = vsel %vm1367_vm4, %v2116_v4, %v1364_v19 }
 0x3e3   : > { %v1413_v17 = vpack.c.bf16 %v1408_v32, %v1407_v59  ;;  %v1385_v35 = vmul.f32 %v1368_v21, %v1289_v22 }
 0x3e4   : > { %v1372_v2 = vmul.f32 0.5, %v1371_v62 }
 0x3e5   : > { %1484 = vmatmul.bf16.gmra.mxu3 %v1413_v17  ;;  %v1393_v13 = vmul.f32 %v2711_v25, %v1385_v35 }
 0x3e6   : > { %v1373_v38 = vsub.f32 1.5, %v1372_v2 }
 0x3e7   : > { %v1401_v40 = vadd.f32 %v2720_v41, %v1393_v13 }
 0x3e8   : > { %v1374_v27 = vmul.f32 %v2118_v16, %v1373_v38 }
 0x3e9   : > { %v1409_v15 = vmax.f32 %v1401_v40, 0.0 }
 0x3ea   : > { %v1378_v31 = vsel %vm1377_vm7, %v2118_v16, %v1374_v27 }
 0x3eb   : > { %v1386_v33 = vmul.f32 %v1378_v31, %v1290_v47  ;;  %v2906_v31 = vld [vmem:[%s3002_s11] ss:$0 sm:$0xff] }
 0x3ed   : > { %v1394_v34 = vmul.f32 %v2711_v25, %v1386_v33 }
 0x3ef   : > { %v1402_v52 = vadd.f32 %v2720_v41, %v1394_v34 }
 0x3f1   : > { %v1410_v44 = vmax.f32 %v1402_v52, 0.0 }
 0x3f3   : > { %v1414_v45 = vpack.c.bf16 %v1410_v44, %v1409_v15  ;;  %v2914_v15 = vld [vmem:[%s3003_s12] ss:$0 sm:$0xff] }
 0x3f5   : > { %1489 = vmatmul.bf16.gmra.mxu3 %v1414_v45 }
 0x448   : > { %v1475_v56 = vpop.f32.mrf.mxu3 }
 0x449   : > { %v2858_v49 = vadd.f32 %v2068_v48, %v1475_v56 }
 0x44b   : > { %1495 = vadd.xlane.f32.xlu0 %v2858_v49  ;;  %v1511_v25 = vmul.f32 %v2858_v49, %v2858_v49 }
 0x44d   : > { %1519 = vadd.xlane.f32.xlu2 %v1511_v25 }
 0x450   : > { %v1477_v43 = vpop.f32.mrf.mxu3 }
 0x451   : > { %v2863_v11 = vadd.f32 %v2068_v48, %v1477_v43 }
 0x453   : > { %1497 = vadd.xlane.f32.xlu1 %v2863_v11  ;;  %v1512_v41 = vmul.f32 %v2863_v11, %v2863_v11 }
 0x455   : > { %1521 = vadd.xlane.f32.xlu0 %v1512_v41 }
 0x458   : > { %v1480_v50 = vpop.f32.mrf.mxu3 }
 0x459   : > { %v2868_v51 = vadd.f32 %v2068_v48, %v1480_v50 }
 0x45b   : > { %1499 = vadd.xlane.f32.xlu2 %v2868_v51  ;;  %v1513_v53 = vmul.f32 %v2868_v51, %v2868_v51 }
 0x45d   : > { %1523 = vadd.xlane.f32.xlu1 %v1513_v53 }
 0x460   : > { %v1482_v54 = vpop.f32.mrf.mxu3 }
 0x461   : > { %v2873_v26 = vadd.f32 %v2068_v48, %v1482_v54 }
 0x463   : > { %1501 = vadd.xlane.f32.xlu0 %v2873_v26  ;;  %v1514_v36 = vmul.f32 %v2873_v26, %v2873_v26 }
 0x465   : > { %1525 = vadd.xlane.f32.xlu2 %v1514_v36 }
 0x468   : > { %v1485_v57 = vpop.f32.mrf.mxu3 }
 0x469   : > { %v2878_v58 = vadd.f32 %v2068_v48, %v1485_v57 }
 0x46b   : > { %1503 = vadd.xlane.f32.xlu1 %v2878_v58  ;;  %v1515_v60 = vmul.f32 %v2878_v58, %v2878_v58 }
 0x46d   : > { %1527 = vadd.xlane.f32.xlu0 %v1515_v60 }
 0x470   : > { %v1487_v61 = vpop.f32.mrf.mxu3 }
 0x471   : > { %v2883_v39 = vadd.f32 %v2068_v48, %v1487_v61 }
 0x473   : > { %1505 = vadd.xlane.f32.xlu2 %v2883_v39  ;;  %v1516_v29 = vmul.f32 %v2883_v39, %v2883_v39 }
 0x478   : > { %v1490_v37 = vpop.f32.mrf.mxu3 }
 0x479   : > { %v2886_v24 = vadd.f32 %v2068_v48, %v1490_v37 }
 0x47b   : > { %1507 = vadd.xlane.f32.xlu0 %v2886_v24  ;;  %v1517_v63 = vmul.f32 %v2886_v24, %v2886_v24 }
 0x47d   : > { %1531 = vadd.xlane.f32.xlu2 %v1517_v63 }
 0x480   : > { %v1492_v0 = vpop.f32.mrf.mxu3 }
 0x481   : > { %v2891_v1 = vadd.f32 %v2068_v48, %v1492_v0 }
 0x483   : > { %1509 = vadd.xlane.f32.xlu1 %v2891_v1  ;;  %v1518_v28 = vmul.f32 %v2891_v1, %v2891_v1 }
 0x485   : > { %1533 = vadd.xlane.f32.xlu0 %v1518_v28 }
 0x48b   : > { %1529 = vadd.xlane.f32.xlu1 %v1516_v29 }
 0x4be   : > { %v1496_v55 = vpop.xlane.xlu0 %1495 }
 0x4bf   : > { %v1535_v3 = vmul.f32 0.1, %v1496_v55 }
 0x4c0   : > { %v1520_v4 = vpop.xlane.xlu2 %1519 }
 0x4c1   : > { %v1551_v5 = vmul.f32 %v1535_v3, %v1535_v3  ;;  %v1543_v6 = vmul.f32 0.1, %v1520_v4  ;;  %v1567_v13 = vsub.f32 %v2858_v49, %v1535_v3 }
 0x4c3   : > { %v1559_v42 = vsub.f32 %v1543_v6, %v1551_v5 }
 0x4c5   : > { %v1575_v7 = vadd.f32 1e-05, %v1559_v42 }
 0x4c6   : > { %v1498_v46 = vpop.xlane.xlu1 %1497 }
 0x4c7   : > { %2119 = vrsqrt.f32 %v1575_v7  ;;  %v1536_v14 = vmul.f32 0.1, %v1498_v46  ;;  %vm1589_vm9 = vweird.f32 %v1575_v7 }
 0x4c8   : > { %v1522_v8 = vpop.xlane.xlu0 %1521 }
 0x4c9   : > { %v1552_v9 = vmul.f32 %v1536_v14, %v1536_v14  ;;  %v1544_v10 = vmul.f32 0.1, %v1522_v8  ;;  %v1568_v60 = vsub.f32 %v2863_v11, %v1536_v14 }
 0x4cb   : > { %v1560_v20 = vsub.f32 %v1544_v10, %v1552_v9 }
 0x4cd   : > { %v2120_v12 = vpop.eup %2119  ;;  %v1576_v30 = vadd.f32 1e-05, %v1560_v20 }
 0x4ce   : > { %v1584_v16 = vmul.f32 %v2120_v12, %v1575_v7  ;;  %v1500_v18 = vpop.xlane.xlu2 %1499  ;;  %vm1590_vm8 = vweird.f32 %v2120_v12 }
 0x4cf   : > { %2121 = vrsqrt.f32 %v1576_v30  ;;  %v2898_v19 = vmul.f32 0.1, %v1500_v18  ;;  %vm1591_vm10 = vmor %vm1589_vm9, %vm1590_vm8  ;;  %vm1599_vm12 = vweird.f32 %v1576_v30 }
 0x4d0   : > { %v1585_v23 = vmul.f32 %v2120_v12, %v1584_v16  ;;  %v1524_v59 = vpop.xlane.xlu1 %1523 }
 0x4d1   : > { %v1553_v32 = vmul.f32 %v2898_v19, %v2898_v19  ;;  %v1545_v62 = vmul.f32 0.1, %v1524_v59  ;;  %v1569_v8 = vsub.f32 %v2868_v51, %v2898_v19 }
 0x4d2   : > { %v1586_v21 = vmul.f32 0.5, %v1585_v23 }
 0x4d3   : > { %v1561_v22 = vsub.f32 %v1545_v62, %v1553_v32 }
 0x4d4   : > { %v1587_v17 = vsub.f32 1.5, %v1586_v21 }
 0x4d5   : > { %v2122_v2 = vpop.eup %2121  ;;  %v1577_v35 = vadd.f32 1e-05, %v1561_v22 }
 0x4d6   : > { %v1588_v38 = vmul.f32 %v2120_v12, %v1587_v17  ;;  %v1594_v27 = vmul.f32 %v2122_v2, %v1576_v30  ;;  %v1502_v47 = vpop.xlane.xlu0 %1501  ;;  %vm1600_vm11 = vweird.f32 %v2122_v2 }
 0x4d7   : > { %2123 = vrsqrt.f32 %v1577_v35  ;;  %v2908_v33 = vmul.f32 0.1, %v1502_v47  ;;  %vm1601_vm13 = vmor %vm1599_vm12, %vm1600_vm11  ;;  %vm1609_vm15 = vweird.f32 %v1577_v35 }
 0x4d8   : > { %v1592_v34 = vsel %vm1591_vm10, %v2120_v12, %v1588_v38  ;;  %v1595_v40 = vmul.f32 %v2122_v2, %v1594_v27  ;;  %v1526_v52 = vpop.xlane.xlu2 %1525 }
 0x4d9   : > { %v1663_v44 = vmul.f32 %v1592_v34, %v1567_v13  ;;  %v1554_v45 = vmul.f32 %v2908_v33, %v2908_v33  ;;  %v1546_v48 = vmul.f32 0.1, %v1526_v52  ;;  %v1570_v51 = vsub.f32 %v2873_v26, %v2908_v33 }
 0x4da   : > { %v1596_v56 = vmul.f32 0.5, %v1595_v40 }
 0x4db   : > { %v1674_v49 = vmul.f32 %v2906_v31, %v1663_v44  ;;  %v1562_v25 = vsub.f32 %v1546_v48, %v1554_v45 }
 0x4dc   : > { %v1597_v43 = vsub.f32 1.5, %v1596_v56 }
 0x4dd   : > { %v2124_v41 = vpop.eup %2123  ;;  %v1685_v50 = vadd.f32 %v2914_v15, %v1674_v49  ;;  %v1578_v53 = vadd.f32 1e-05, %v1562_v25 }
 0x4de   : > { %v1598_v54 = vmul.f32 %v2122_v2, %v1597_v43  ;;  %v1604_v36 = vmul.f32 %v2124_v41, %v1577_v35  ;;  %v1504_v57 = vpop.xlane.xlu1 %1503  ;;  %vm1610_vm14 = vweird.f32 %v2124_v41 }
 0x4df   : > { %1693 = vst [vmem:[%s2920_s20] sm:$0xff] %v1685_v50  ;;  %2125 = vrsqrt.f32 %v1578_v53  ;;  %v2924_v61 = vmul.f32 0.1, %v1504_v57  ;;  %vm1611_vm0 = vmor %vm1609_vm15, %vm1610_vm14  ;;  %vm1619_vm2 = vweird.f32 %v1578_v53 }
 0x4e0   : > { %v1602_v37 = vsel %vm1601_vm13, %v2122_v2, %v1598_v54  ;;  %v1605_v63 = vmul.f32 %v2124_v41, %v1604_v36  ;;  %v1528_v0 = vpop.xlane.xlu0 %1527 }
 0x4e1   : > { %v1664_v28 = vmul.f32 %v1602_v37, %v1568_v60  ;;  %v1555_v29 = vmul.f32 %v2924_v61, %v2924_v61  ;;  %v1547_v55 = vmul.f32 0.1, %v1528_v0  ;;  %v1571_v33 = vsub.f32 %v2878_v58, %v2924_v61 }
 0x4e2   : > { %v1606_v3 = vmul.f32 0.5, %v1605_v63 }
 0x4e3   : > { %v1675_v4 = vmul.f32 %v2906_v31, %v1664_v28  ;;  %v1563_v5 = vsub.f32 %v1547_v55, %v1555_v29 }
 0x4e4   : > { %v1607_v6 = vsub.f32 1.5, %v1606_v3 }
 0x4e5   : > { %v2126_v11 = vpop.eup %2125  ;;  %v1686_v42 = vadd.f32 %v2914_v15, %v1675_v4  ;;  %v1579_v7 = vadd.f32 1e-05, %v1563_v5 }
 0x4e6   : > { %v1608_v46 = vmul.f32 %v2124_v41, %v1607_v6  ;;  %v1614_v14 = vmul.f32 %v2126_v11, %v1578_v53  ;;  %v1506_v20 = vpop.xlane.xlu2 %1505  ;;  %vm1620_vm1 = vweird.f32 %v2126_v11 }
 0x4e7   : > { %1694 = vst [vmem:[%s2920_s20 + $0x8] sm:$0xff] %v1686_v42  ;;  %2127 = vrsqrt.f32 %v1579_v7  ;;  %vm1621_vm3 = vmor %vm1619_vm2, %vm1620_vm1  ;;  %vm1629_vm5 = vweird.f32 %v1579_v7  ;;  %v1540_v53 = vmul.f32 0.1, %v1506_v20 }
 0x4e8   : > { %v1612_v9 = vsel %vm1611_vm0, %v2124_v41, %v1608_v46  ;;  %v1615_v10 = vmul.f32 %v2126_v11, %v1614_v14 }
 0x4e9   : > { %v1665_v12 = vmul.f32 %v1612_v9, %v1569_v8  ;;  %v1556_v58 = vmul.f32 %v1540_v53, %v1540_v53 }
 0x4ea   : > { %v1616_v30 = vmul.f32 0.5, %v1615_v10 }
 0x4eb   : > { %v1676_v16 = vmul.f32 %v2906_v31, %v1665_v12 }
 0x4ec   : > { %v1617_v18 = vsub.f32 1.5, %v1616_v30 }
 0x4ed   : > { %v2128_v23 = vpop.eup %2127  ;;  %v1687_v59 = vadd.f32 %v2914_v15, %v1676_v16 }
 0x4ee   : > { %v1618_v32 = vmul.f32 %v2126_v11, %v1617_v18  ;;  %v1624_v62 = vmul.f32 %v2128_v23, %v1579_v7  ;;  %v1508_v21 = vpop.xlane.xlu0 %1507  ;;  %vm1630_vm4 = vweird.f32 %v2128_v23 }
 0x4ef   : > { %1695 = vst [vmem:[%s2920_s20 + $0x10] sm:$0xff] %v1687_v59  ;;  %v1541_v19 = vmul.f32 0.1, %v1508_v21  ;;  %vm1631_vm6 = vmor %vm1629_vm5, %vm1630_vm4 }
 0x4f0   : > { %v1622_v22 = vsel %vm1621_vm3, %v2126_v11, %v1618_v32  ;;  %v1625_v17 = vmul.f32 %v2128_v23, %v1624_v62  ;;  %v1532_v2 = vpop.xlane.xlu2 %1531 }
 0x4f1   : > { %v1666_v35 = vmul.f32 %v1622_v22, %v1570_v51  ;;  %v1557_v38 = vmul.f32 %v1541_v19, %v1541_v19  ;;  %v1549_v27 = vmul.f32 0.1, %v1532_v2  ;;  %v1573_v11 = vsub.f32 %v2886_v24, %v1541_v19 }
 0x4f2   : > { %v1626_v47 = vmul.f32 0.5, %v1625_v17 }
 0x4f3   : > { %v1677_v13 = vmul.f32 %v2906_v31, %v1666_v35  ;;  %v1565_v34 = vsub.f32 %v1549_v27, %v1557_v38 }
 0x4f4   : > { %v1627_v40 = vsub.f32 1.5, %v1626_v47 }
 0x4f5   : > { %v1688_v52 = vadd.f32 %v2914_v15, %v1677_v13  ;;  %v1581_v44 = vadd.f32 1e-05, %v1565_v34 }
 0x4f6   : > { %v1628_v45 = vmul.f32 %v2128_v23, %v1627_v40  ;;  %v1510_v26 = vpop.xlane.xlu1 %1509 }
 0x4f7   : > { %1696 = vst [vmem:[%s2920_s20 + $0x18] sm:$0xff] %v1688_v52  ;;  %2129 = vrsqrt.f32 %v1581_v44  ;;  %v1542_v48 = vmul.f32 0.1, %v1510_v26  ;;  %vm1649_vm8 = vweird.f32 %v1581_v44 }
 0x4f8   : > { %v1632_v56 = vsel %vm1631_vm6, %v2128_v23, %v1628_v45  ;;  %v1534_v49 = vpop.xlane.xlu0 %1533 }
 0x4f9   : > { %v1667_v25 = vmul.f32 %v1632_v56, %v1571_v33  ;;  %v1558_v43 = vmul.f32 %v1542_v48, %v1542_v48  ;;  %v1550_v41 = vmul.f32 0.1, %v1534_v49  ;;  %v1574_v24 = vsub.f32 %v2891_v1, %v1542_v48 }
 0x4fa   : > { %v1572_v1 = vsub.f32 %v2883_v39, %v1540_v53 }
 0x4fb   : > { %v1678_v50 = vmul.f32 %v2906_v31, %v1667_v25  ;;  %v1566_v54 = vsub.f32 %v1550_v41, %v1558_v43 }
 0x4fd   : > { %v2130_v36 = vpop.eup %2129  ;;  %v1689_v57 = vadd.f32 %v2914_v15, %v1678_v50  ;;  %v1582_v60 = vadd.f32 1e-05, %v1566_v54 }
 0x4fe   : > { %v1644_v37 = vmul.f32 %v2130_v36, %v1581_v44  ;;  %v1530_v63 = vpop.xlane.xlu1 %1529  ;;  %vm1650_vm7 = vweird.f32 %v2130_v36 }
 0x4ff   : > { %1697 = vst [vmem:[%s2920_s20 + $0x20] sm:$0xff] %v1689_v57  ;;  %2131 = vrsqrt.f32 %v1582_v60  ;;  %v1548_v61 = vmul.f32 0.1, %v1530_v63  ;;  %vm1651_vm9 = vmor %vm1649_vm8, %vm1650_vm7  ;;  %vm1659_vm11 = vweird.f32 %v1582_v60 }
 0x500   : > { %v1645_v0 = vmul.f32 %v2130_v36, %v1644_v37 }
 0x501   : > { %v1564_v28 = vsub.f32 %v1548_v61, %v1556_v58 }
 0x502   : > { %v1646_v29 = vmul.f32 0.5, %v1645_v0 }
 0x503   : > { %v1580_v55 = vadd.f32 1e-05, %v1564_v28 }
 0x504   : > { %v1647_v3 = vsub.f32 1.5, %v1646_v29 }
 0x505   : > { %v2132_v4 = vpop.eup %2131  ;;  %2133 = vrsqrt.f32 %v1580_v55  ;;  %vm1639_vm14 = vweird.f32 %v1580_v55 }
 0x506   : > { %v1648_v5 = vmul.f32 %v2130_v36, %v1647_v3  ;;  %v1654_v6 = vmul.f32 %v2132_v4, %v1582_v60  ;;  %vm1660_vm10 = vweird.f32 %v2132_v4 }
 0x507   : > { %vm1661_vm12 = vmor %vm1659_vm11, %vm1660_vm10 }
 0x508   : > { %v1652_v42 = vsel %vm1651_vm9, %v2130_v36, %v1648_v5  ;;  %v1655_v7 = vmul.f32 %v2132_v4, %v1654_v6 }
 0x509   : > { %v1669_v46 = vmul.f32 %v1652_v42, %v1573_v11 }
 0x50a   : > { %v1656_v14 = vmul.f32 0.5, %v1655_v7 }
 0x50b   : > { %v2134_v8 = vpop.eup %2133  ;;  %v1680_v9 = vmul.f32 %v2906_v31, %v1669_v46 }
 0x50c   : > { %v1657_v10 = vsub.f32 1.5, %v1656_v14  ;;  %v1634_v20 = vmul.f32 %v2134_v8, %v1580_v55  ;;  %vm1640_vm13 = vweird.f32 %v2134_v8 }
 0x50d   : > { %v1691_v12 = vadd.f32 %v2914_v15, %v1680_v9  ;;  %vm1641_vm15 = vmor %vm1639_vm14, %vm1640_vm13 }
 0x50e   : > { %v1658_v30 = vmul.f32 %v2132_v4, %v1657_v10  ;;  %v1635_v16 = vmul.f32 %v2134_v8, %v1634_v20 }
 0x50f   : > { %1699 = vst [vmem:[%s2920_s20 + $0x30] sm:$0xff] %v1691_v12 }
 0x510   : > { %v1662_v18 = vsel %vm1661_vm12, %v2132_v4, %v1658_v30  ;;  %v1636_v23 = vmul.f32 0.5, %v1635_v16 }
 0x511   : > { %v1670_v59 = vmul.f32 %v1662_v18, %v1574_v24 }
 0x512   : > { %v1637_v32 = vsub.f32 1.5, %v1636_v23 }
 0x513   : > { %v1681_v62 = vmul.f32 %v2906_v31, %v1670_v59 }
 0x514   : > { %v1638_v21 = vmul.f32 %v2134_v8, %v1637_v32 }
 0x515   : > { %v1692_v51 = vadd.f32 %v2914_v15, %v1681_v62 }
 0x516   : > { %v1642_v19 = vsel %vm1641_vm15, %v2134_v8, %v1638_v21 }
 0x517   : > { %1700 = vst [vmem:[%s2920_s20 + $0x38] sm:$0xff] %v1692_v51  ;;  %v1668_v22 = vmul.f32 %v1642_v19, %v1572_v1 }
 0x519   : > { %v1679_v17 = vmul.f32 %v2906_v31, %v1668_v22 }
 0x51b   : > { %v1690_v2 = vadd.f32 %v2914_v15, %v1679_v17 }
 0x51d   : > { %1698 = vst [vmem:[%s2920_s20 + $0x28] sm:$0xff] %v1690_v2 }
 0x51e   : > { %2282 = shalt.err (!%p2279_p10)
}
 0x51f   : > { %s2336_s9 = smov 128   ;;  %s2337_s20 = smov 8  }
 0x520   : > { %1995 = dma.vmem_to_hbm [thread:$0]  (%p2498_p0), %s1715_s29, 1024, %s1717_s1, %s1702_s24, %s2336_s9, %s2336_s9, %s2337_s20  }
 0x521 PF: > { %s3028_s22 = sld [smem:[#allocation15_spill]]  ;;  %p2022_p11 = scmp.ge.s32.totalorder %s2329_s28, 2 }
 0x523   : > { %p2012_p12 = pnand %p2022_p11, %p2443_p6 }
 0x525   : > { %p2013_p13 = pneg %p2012_p12 }
 0x527   : > { %s1731_s5 = sand.u32 1, %s3028_s22  }
 0x528   : > { %s1732_s23 = scalar_lea.sflag [#allocation4], %s1731_s5 }
 0x529   : > { %2312 = dma.done.wait (%p2013_p13), %s1732_s23, 1024  }
 0x52a   : > { %2314 = vsyncadd (%p2013_p13), %s1732_s23, 4294966272  ;;  %s3030_s27 = sld [smem:[#allocation16_spill]]  ;;  %p28_p3 = scmp.ge.s32.totalorder %s2480_s15, 6  }
 0x52b   : > { %s3031_s14 = sld [smem:[#allocation18_spill]]  ;;  %s3032_s25 = smov %s2321_s26 }
 0x52c   : > { %s3035_s28 = smov %s2480_s15 }
 0x52d   :  { %30 = sbr.rel (!%p28_p3) target bundleno = 11 (0xb), region = 129 }
 0x530   : > { %s3033_s26 = smov %s3030_s27 }
 0x531   : > { %s3034_s27 = smov %s3031_s14 }
 0x532   :  { %1738 = vsyncpa [#allocation3], 1 }
 0x533   :  { %1740 = vsyncpa [#allocation3 + $0x1], 1 }
 0x534   :  { %1741 = vsyncpa [#allocation6], 1 }
 0x535   :  { %1742 = vsyncpa [#allocation9], 1 }
 0x536   :  { %1743 = vsyncpa [#allocation4], 1 }
 0x537   :  { %1745 = vsyncpa [#allocation4 + $0x1], 1 }

</bundles_post_ra>
